<compile_context>
chip_gen: v5e
topology: v5e:2x2
jax: 0.10.0
libtpu: 0.0.40
codegen_flags: <defaults>
</compile_context>

<pallas_src>
import jax
import jax.numpy as jnp
from jax import lax
from jax.experimental import pallas as pl
from jax.experimental.pallas import tpu as pltpu

B_PAD = 8    # f32 sublane tile
I_PAD = 16   # padded input-feature dim (keeps weight-slab row offsets aligned)


# ---------------------------------------------------------------------------
# Kernel
# ---------------------------------------------------------------------------
def _ensemble_margin_kernel(
    x_ref,    # [T, B_pad, I_pad] bf16  time-major input (zero-padded batch/feat)
    wl_ref,   # [I_pad + 6H, 8H]  bf16  packed LSTM weights: wx0 | wh0 | w1a | w1b
    wm_ref,   # [I_pad + H, H]    bf16  packed MLP weights:  wm1 | wm2
    wh_ref,   # [3H, 2]           bf16  packed head weights: (h1 rows | mlp rows)
    b_ref,    # [8, 8H]           f32   biases: b0 | b1 | bm1 | bm2 | bhead
    out_ref,  # [B_pad, 2]        f32   col 0 = pred_return, col 1 = confidence
):
    T, B, Ip = x_ref.shape
    G = wl_ref.shape[1]          # 8H (4 gates x 2 LSTM branches)
    H2 = G // 4                  # 2H (the two branches stacked on lanes)
    H = wm_ref.shape[1]          # H

    # ---- one-time static slices of the packed weight slabs (bf16) ----------
    wx0 = wl_ref[0:Ip, :]                      # [Ip, 8H] layer-0 input proj
    wh0 = wl_ref[Ip:Ip + H2, :]                # [2H, 8H] layer-0 recurrent
    w1a = wl_ref[Ip + H2:Ip + 2 * H2, :]       # [2H, 8H] layer-1, h0 rows
    w1b = wl_ref[Ip + 2 * H2:Ip + 3 * H2, :]   # [2H, 8H] layer-1, h1 rows
    wm1 = wm_ref[0:Ip, :]                      # [Ip, H]  MLP fc1
    wm2 = wm_ref[Ip:Ip + H, :]                 # [H, H]   MLP fc2
    whead_a = wh_ref[0:H2, :]                  # [2H, 2]  head, h1 rows
    whead_b = wh_ref[H2:H2 + H, :]             # [H, 2]   head, mlp rows

    b0 = b_ref[0:1, :]                                   # [1, 8H]
    b1 = jnp.broadcast_to(b_ref[1:2, :], (B, G))         # hoisted broadcast
    bm1 = b_ref[2:3, 0:H]
    bm2 = b_ref[3:4, 0:H]
    bhead = b_ref[4:5, 0:2]

    # ---- hoisted layer-0 input projection for all T steps & both LSTMs -----
    x_all = x_ref[...]                                            # [T, B, Ip]
    xg0 = (jnp.dot(x_all.reshape(T * B, Ip), wx0,
                   preferred_element_type=jnp.float32)
           + b0).reshape(T, B, G)                                 # [T, B, 8H]

    def gate_math(gates, c):
        # Fused gate lanes: [ i | f | o | g ], each block 2H wide with
        # [lstm1 | lstm2] inside a block — same layout as c / h, so the
        # elementwise math handles both branches at once.  One sigmoid over
        # the contiguous 6H block, one tanh over the trailing 2H block.
        sig = jax.nn.sigmoid(gates[:, 0:3 * H2])
        g_g = jnp.tanh(gates[:, 3 * H2:])
        i_g = sig[:, 0:H2]
        f_g = sig[:, H2:2 * H2]
        o_g = sig[:, 2 * H2:3 * H2]
        c_new = f_g * c + i_g * g_g
        h_new = o_g * jnp.tanh(c_new)
        return h_new, c_new

    bf16 = jnp.bfloat16
    zeros = jnp.zeros((B, H2), jnp.float32)
    h0, c0 = zeros, zeros        # layer-0 state, both LSTMs: [h_1 | h_2]
    h1, c1 = zeros, zeros        # layer-1 state, both LSTMs

    # Fully unrolled recurrence (T is small & static).  bf16 MXU operands,
    # f32 accumulation and f32 gate math.  The h1@w1b matmul only depends on
    # the previous step, so it overlaps the g0 chain of step t.
    for t in range(T):
        g0 = jnp.dot(h0.astype(bf16), wh0,
                     preferred_element_type=jnp.float32) + xg0[t]
        h0, c0 = gate_math(g0, c0)
        # (inter-layer dropout skipped: eval semantics)
        g1 = (jnp.dot(h0.astype(bf16), w1a, preferred_element_type=jnp.float32)
              + jnp.dot(h1.astype(bf16), w1b, preferred_element_type=jnp.float32)
              + b1)
        h1, c1 = gate_math(g1, c1)

    # ---- MLP branch on the last timestep (dropout = identity in eval) ------
    x_last = x_ref[T - 1]                                         # [B, Ip]
    m = jnp.maximum(
        jnp.dot(x_last, wm1, preferred_element_type=jnp.float32) + bm1, 0.0)
    m = jnp.maximum(
        jnp.dot(m.astype(bf16), wm2, preferred_element_type=jnp.float32) + bm2, 0.0)

    # ---- fused output head (three 32->1 heads composed with fc_agg) --------
    final = (jnp.dot(h1.astype(bf16), whead_a, preferred_element_type=jnp.float32)
             + jnp.dot(m.astype(bf16), whead_b, preferred_element_type=jnp.float32)
             + bhead)                                             # [B, 2]

    # col 0 = pred_return, col 1 = sigmoid(confidence logit).
    col = lax.broadcasted_iota(jnp.int32, final.shape, 1)
    out_ref[...] = jnp.where(col == 0, final, jax.nn.sigmoid(final))


# ---------------------------------------------------------------------------
# Wrapper
# ---------------------------------------------------------------------------
@jax.jit
def ensemble_margin_forward(x, fused):
    """x: [B, T, I] float32 (batch_first).  Returns (pred_return [B,1], confidence [B,1])."""
    B, T, I = x.shape
    b_pad = ((B + B_PAD - 1) // B_PAD) * B_PAD
    xt = jnp.transpose(x, (1, 0, 2)).astype(jnp.bfloat16)        # [T, B, I]
    x_pad = jnp.zeros((T, b_pad, I_PAD), jnp.bfloat16).at[:, :B, :I].set(xt)

    vmem = pl.BlockSpec(memory_space=pltpu.MemorySpace.VMEM)
    out = pl.pallas_call(
        _ensemble_margin_kernel,
        out_shape=jax.ShapeDtypeStruct((b_pad, 2), jnp.float32),
        in_specs=[vmem] * (1 + len(fused)),
        out_specs=vmem,
    )(x_pad, *fused)
    return out[:B, 0:1], out[:B, 1:2]


# ---------------------------------------------------------------------------
# Parameters (PyTorch-layout) and one-time weight fusion for the kernel
# ---------------------------------------------------------------------------
def init_torch_params(key, input_size=12, hidden_size=32):
    """PyTorch-shaped params with U(-1/sqrt(fan), 1/sqrt(fan)) init."""
    H, I = hidden_size, input_size
    ks = iter(jax.random.split(key, 32))

    def u(shape, fan):
        k = 1.0 / jnp.sqrt(jnp.float32(fan))
        return jax.random.uniform(next(ks), shape, jnp.float32, -k, k)

    def lstm_branch():
        return {
            "w_ih_l0": u((4 * H, I), H), "w_hh_l0": u((4 * H, H), H),
            "b_ih_l0": u((4 * H,), H), "b_hh_l0": u((4 * H,), H),
            "w_ih_l1": u((4 * H, H), H), "w_hh_l1": u((4 * H, H), H),
            "b_ih_l1": u((4 * H,), H), "b_hh_l1": u((4 * H,), H),
            "fc_w": u((1, H), H), "fc_b": u((1,), H),
        }

    return {
        "lstm1": lstm_branch(),
        "lstm2": lstm_branch(),
        "mlp": {
            "w1": u((H, I), I), "b1": u((H,), I),
            "w2": u((H, H), H), "b2": u((H,), H),
            "w3": u((1, H), H), "b3": u((1,), H),
        },
        "agg": {"w": u((2, 3), 3), "b": u((2,), 3)},
    }


def fuse_params(p, hidden_size=32, input_size=12):
    """Build the packed / pre-transposed bf16 weight slabs the kernel expects."""
    H, I = hidden_size, input_size
    Ip = I_PAD
    H2, G = 2 * H, 8 * H

    def interleave_gates(wa, wb):
        # wa, wb: [X, 4H] with PyTorch gate order (i, f, g, o) on columns.
        # Fused column order: [ i_a i_b | f_a f_b | o_a o_b | g_a g_b ]
        # (sigmoid gates contiguous, tanh gate last).
        cols = []
        for g in (0, 1, 3, 2):          # i, f, o, g
            cols.append(wa[:, g * H:(g + 1) * H])
            cols.append(wb[:, g * H:(g + 1) * H])
        return jnp.concatenate(cols, axis=1)

    l1, l2 = p["lstm1"], p["lstm2"]
    z_h = jnp.zeros((H, 4 * H), jnp.float32)

    # Layer-0 input projection (shared x): [I, 8H]
    wx0 = interleave_gates(l1["w_ih_l0"].T, l2["w_ih_l0"].T)
    b0 = interleave_gates((l1["b_ih_l0"] + l1["b_hh_l0"])[None, :],
                          (l2["b_ih_l0"] + l2["b_hh_l0"])[None, :])
    # Layer-0 recurrent: block structure over the stacked state [h0_1 | h0_2].
    wh0 = interleave_gates(jnp.concatenate([l1["w_hh_l0"].T, z_h], axis=0),
                           jnp.concatenate([z_h, l2["w_hh_l0"].T], axis=0))
    # Layer-1 split: w1a acts on [h0_1 | h0_2], w1b acts on [h1_1 | h1_2].
    w1a = interleave_gates(jnp.concatenate([l1["w_ih_l1"].T, z_h], axis=0),
                           jnp.concatenate([z_h, l2["w_ih_l1"].T], axis=0))
    w1b = interleave_gates(jnp.concatenate([l1["w_hh_l1"].T, z_h], axis=0),
                           jnp.concatenate([z_h, l2["w_hh_l1"].T], axis=0))
    b1 = interleave_gates((l1["b_ih_l1"] + l1["b_hh_l1"])[None, :],
                          (l2["b_ih_l1"] + l2["b_hh_l1"])[None, :])

    # Packed LSTM weight slab [Ip + 6H, 8H]: wx0 | wh0 | w1a | w1b.
    w_lstm = jnp.zeros((Ip + 3 * H2, G), jnp.float32)
    w_lstm = w_lstm.at[0:I, :].set(wx0)
    w_lstm = w_lstm.at[Ip:Ip + H2, :].set(wh0)
    w_lstm = w_lstm.at[Ip + H2:Ip + 2 * H2, :].set(w1a)
    w_lstm = w_lstm.at[Ip + 2 * H2:Ip + 3 * H2, :].set(w1b)

    # Packed MLP weight slab [Ip + H, H]: wm1 | wm2.
    m = p["mlp"]
    w_mlp = jnp.zeros((Ip + H, H), jnp.float32)
    w_mlp = w_mlp.at[0:I, :].set(m["w1"].T)
    w_mlp = w_mlp.at[Ip:Ip + H, :].set(m["w2"].T)

    # Fused output head: compose the three 32->1 heads with fc_agg (affine
    # chain).  Rows: [h1_1 | h1_2 | mlp_hidden] -> [3H, 2].
    wagg_t = p["agg"]["w"].T                                      # [3, 2]
    w_head = jnp.concatenate([
        l1["fc_w"].T @ wagg_t[0:1, :],
        l2["fc_w"].T @ wagg_t[1:2, :],
        m["w3"].T @ wagg_t[2:3, :],
    ], axis=0)                                                    # [3H, 2]
    bhead = (jnp.concatenate([l1["fc_b"], l2["fc_b"], m["b3"]])[None, :] @ wagg_t
             + p["agg"]["b"][None, :])                            # [1, 2]

    # Bias slab [8, 8H] f32: b0 | b1 | bm1 | bm2 | bhead.
    b_all = jnp.zeros((8, G), jnp.float32)
    b_all = b_all.at[0:1, :].set(b0)
    b_all = b_all.at[1:2, :].set(b1)
    b_all = b_all.at[2, 0:H].set(m["b1"])
    b_all = b_all.at[3, 0:H].set(m["b2"])
    b_all = b_all.at[4, 0:2].set(bhead[0])

    return (w_lstm.astype(jnp.bfloat16),
            w_mlp.astype(jnp.bfloat16),
            w_head.astype(jnp.bfloat16),
            b_all)


# ---------------------------------------------------------------------------
# Pure-JAX reference (straight translation of the PyTorch module, eval mode)
# ---------------------------------------------------------------------------
def _mm(a, b):
    return jnp.dot(a, b, precision=lax.Precision.HIGHEST)


def reference_forward(x, p):
    def lstm_branch(x, q):
        B, T, _ = x.shape
        H = q["w_hh_l0"].shape[1]
        h0 = c0 = h1 = c1 = jnp.zeros((B, H), jnp.float32)

        def cell(xin, h, c, wih, whh, bih, bhh):
            g = _mm(xin, wih.T) + bih + _mm(h, whh.T) + bhh
            i = jax.nn.sigmoid(g[:, 0 * H:1 * H])
            f = jax.nn.sigmoid(g[:, 1 * H:2 * H])
            gg = jnp.tanh(g[:, 2 * H:3 * H])
            o = jax.nn.sigmoid(g[:, 3 * H:4 * H])
            c = f * c + i * gg
            return o * jnp.tanh(c), c

        for t in range(T):
            h0, c0 = cell(x[:, t, :], h0, c0, q["w_ih_l0"], q["w_hh_l0"],
                          q["b_ih_l0"], q["b_hh_l0"])
            h1, c1 = cell(h0, h1, c1, q["w_ih_l1"], q["w_hh_l1"],
                          q["b_ih_l1"], q["b_hh_l1"])
        return _mm(h1, q["fc_w"].T) + q["fc_b"]

    out1 = lstm_branch(x, p["lstm1"])
    out2 = lstm_branch(x, p["lstm2"])
    m = p["mlp"]
    xm = x[:, -1, :]
    hm = jax.nn.relu(_mm(xm, m["w1"].T) + m["b1"])
    hm = jax.nn.relu(_mm(hm, m["w2"].T) + m["b2"])
    out3 = _mm(hm, m["w3"].T) + m["b3"]
    combined = jnp.concatenate([out1, out2, out3], axis=1)
    final = _mm(combined, p["agg"]["w"].T) + p["agg"]["b"]
    return final[:, 0:1], jax.nn.sigmoid(final[:, 1:2])


# ---------------------------------------------------------------------------
if __name__ == "__main__":
    B, T, I, H = 2, 8, 12, 32
    key = jax.random.PRNGKey(0)
    kx, kp = jax.random.split(key)
    x = jax.random.normal(kx, (B, T, I), jnp.float32)

    params = init_torch_params(kp, input_size=I, hidden_size=H)
    fused = fuse_params(params, hidden_size=H, input_size=I)

    pred, conf = ensemble_margin_forward(x, fused)
    jax.block_until_ready((pred, conf))
    assert pred.shape == (B, 1) and conf.shape == (B, 1), (pred.shape, conf.shape)

    # Parity check against the pure-JAX translation of the PyTorch module
    # (tolerance absorbs bf16 MXU-operand rounding over the T=8 recurrence).
    ref_pred, ref_conf = reference_forward(x, params)
    assert jnp.allclose(pred, ref_pred, rtol=2e-2, atol=2e-2), (pred, ref_pred)
    assert jnp.allclose(conf, ref_conf, rtol=2e-2, atol=2e-2), (conf, ref_conf)

    print("KERNEL_OK")
</pallas_src>

<mosaic_0001>
module attributes {stable_mosaic.version = 11 : i64} {
  func.func @_ensemble_margin_kernel(%arg0: memref<8x8x16xbf16, #tpu.memory_space<vmem>>, %arg1: memref<208x256xbf16, #tpu.memory_space<vmem>>, %arg2: memref<48x32xbf16, #tpu.memory_space<vmem>>, %arg3: memref<96x2xbf16, #tpu.memory_space<vmem>>, %arg4: memref<8x256xf32, #tpu.memory_space<vmem>>, %arg5: memref<8x2xf32, #tpu.memory_space<vmem>>) attributes {dimension_semantics = [], scalar_prefetch = 0 : i64, scratch_operands = 0 : i64, tpu.core_type = #tpu.core_type<tc>} {
    %c0 = arith.constant 0 : index
    %c0_0 = arith.constant 0 : index
    %0 = vector.load %arg1[%c0, %c0_0] : memref<208x256xbf16, #tpu.memory_space<vmem>>, vector<16x256xbf16>
    %c16 = arith.constant 16 : index
    %c0_1 = arith.constant 0 : index
    %1 = vector.load %arg1[%c16, %c0_1] : memref<208x256xbf16, #tpu.memory_space<vmem>>, vector<64x256xbf16>
    %c80 = arith.constant 80 : index
    %c0_2 = arith.constant 0 : index
    %2 = vector.load %arg1[%c80, %c0_2] : memref<208x256xbf16, #tpu.memory_space<vmem>>, vector<64x256xbf16>
    %c144 = arith.constant 144 : index
    %c0_3 = arith.constant 0 : index
    %3 = vector.load %arg1[%c144, %c0_3] : memref<208x256xbf16, #tpu.memory_space<vmem>>, vector<64x256xbf16>
    %c0_4 = arith.constant 0 : index
    %c0_5 = arith.constant 0 : index
    %4 = vector.load %arg2[%c0_4, %c0_5] : memref<48x32xbf16, #tpu.memory_space<vmem>>, vector<16x32xbf16>
    %c16_6 = arith.constant 16 : index
    %c0_7 = arith.constant 0 : index
    %5 = vector.load %arg2[%c16_6, %c0_7] : memref<48x32xbf16, #tpu.memory_space<vmem>>, vector<32x32xbf16>
    %c0_8 = arith.constant 0 : index
    %c0_9 = arith.constant 0 : index
    %6 = vector.load %arg3[%c0_8, %c0_9] : memref<96x2xbf16, #tpu.memory_space<vmem>>, vector<64x2xbf16>
    %c64 = arith.constant 64 : index
    %c0_10 = arith.constant 0 : index
    %7 = vector.load %arg3[%c64, %c0_10] : memref<96x2xbf16, #tpu.memory_space<vmem>>, vector<32x2xbf16>
    %c0_11 = arith.constant 0 : index
    %c0_12 = arith.constant 0 : index
    %8 = vector.load %arg4[%c0_11, %c0_12] : memref<8x256xf32, #tpu.memory_space<vmem>>, vector<1x256xf32>
    %c1 = arith.constant 1 : index
    %c0_13 = arith.constant 0 : index
    %9 = vector.load %arg4[%c1, %c0_13] : memref<8x256xf32, #tpu.memory_space<vmem>>, vector<1x256xf32>
    %10 = vector.shape_cast %9 : vector<1x256xf32> to vector<1x256xf32>
    %11 = vector.broadcast %10 : vector<1x256xf32> to vector<8x256xf32>
    %c2 = arith.constant 2 : index
    %c0_14 = arith.constant 0 : index
    %12 = vector.load %arg4[%c2, %c0_14] : memref<8x256xf32, #tpu.memory_space<vmem>>, vector<1x32xf32>
    %c3 = arith.constant 3 : index
    %c0_15 = arith.constant 0 : index
    %13 = vector.load %arg4[%c3, %c0_15] : memref<8x256xf32, #tpu.memory_space<vmem>>, vector<1x32xf32>
    %c4 = arith.constant 4 : index
    %c0_16 = arith.constant 0 : index
    %14 = vector.load %arg4[%c4, %c0_16] : memref<8x256xf32, #tpu.memory_space<vmem>>, vector<1x2xf32>
    %c0_17 = arith.constant 0 : index
    %c0_18 = arith.constant 0 : index
    %c0_19 = arith.constant 0 : index
    %15 = vector.load %arg0[%c0_17, %c0_18, %c0_19] : memref<8x8x16xbf16, #tpu.memory_space<vmem>>, vector<8x8x16xbf16>
    %16 = vector.shape_cast %15 : vector<8x8x16xbf16> to vector<64x16xbf16>
    %cst = arith.constant dense<0.000000e+00> : vector<64x256xf32>
    %17 = tpu.matmul %16, %0, %cst {dimension_numbers = #tpu.dot_dimension_numbers<[1], [0], [0], [1], [0, 0, 1, 1], [], []>} : vector<64x16xbf16>, vector<16x256xbf16>, vector<64x256xf32> -> vector<64x256xf32>
    %18 = vector.broadcast %8 : vector<1x256xf32> to vector<64x256xf32>
    %19 = arith.addf %17, %18 : vector<64x256xf32>
    %20 = vector.shape_cast %19 : vector<64x256xf32> to vector<8x8x256xf32>
    %cst_20 = arith.constant 0.000000e+00 : f32
    %21 = vector.broadcast %cst_20 : f32 to vector<8x64xf32>
    %22 = arith.truncf %21 : vector<8x64xf32> to vector<8x64xbf16>
    %cst_21 = arith.constant dense<0.000000e+00> : vector<8x256xf32>
    %23 = tpu.matmul %22, %1, %cst_21 {dimension_numbers = #tpu.dot_dimension_numbers<[1], [0], [0], [1], [0, 0, 1, 1], [], []>} : vector<8x64xbf16>, vector<64x256xbf16>, vector<8x256xf32> -> vector<8x256xf32>
    %24 = vector.extract_strided_slice %20 {offsets = [0, 0, 0], sizes = [1, 8, 256], strides = [1, 1, 1]} : vector<8x8x256xf32> to vector<1x8x256xf32>
    %25 = vector.shape_cast %24 : vector<1x8x256xf32> to vector<8x256xf32>
    %26 = arith.addf %23, %25 : vector<8x256xf32>
    %27 = vector.extract_strided_slice %26 {offsets = [0, 0], sizes = [8, 192], strides = [1, 1]} : vector<8x256xf32> to vector<8x192xf32>
    %28 = arith.negf %27 : vector<8x192xf32>
    %29 = math.exp %28 : vector<8x192xf32>
    %cst_22 = arith.constant 1.000000e+00 : f32
    %30 = vector.broadcast %cst_22 : f32 to vector<8x192xf32>
    %31 = arith.addf %30, %29 : vector<8x192xf32>
    %32 = arith.divf %30, %31 : vector<8x192xf32>
    %33 = vector.extract_strided_slice %26 {offsets = [0, 192], sizes = [8, 64], strides = [1, 1]} : vector<8x256xf32> to vector<8x64xf32>
    %34 = math.tanh %33 : vector<8x64xf32>
    %35 = vector.extract_strided_slice %32 {offsets = [0, 0], sizes = [8, 64], strides = [1, 1]} : vector<8x192xf32> to vector<8x64xf32>
    %36 = vector.extract_strided_slice %32 {offsets = [0, 64], sizes = [8, 64], strides = [1, 1]} : vector<8x192xf32> to vector<8x64xf32>
    %37 = vector.extract_strided_slice %32 {offsets = [0, 128], sizes = [8, 64], strides = [1, 1]} : vector<8x192xf32> to vector<8x64xf32>
    %38 = arith.mulf %36, %21 : vector<8x64xf32>
    %39 = arith.mulf %35, %34 : vector<8x64xf32>
    %40 = arith.addf %38, %39 : vector<8x64xf32>
    %41 = math.tanh %40 : vector<8x64xf32>
    %42 = arith.mulf %37, %41 : vector<8x64xf32>
    %43 = arith.truncf %42 : vector<8x64xf32> to vector<8x64xbf16>
    %cst_23 = arith.constant dense<0.000000e+00> : vector<8x256xf32>
    %44 = tpu.matmul %43, %2, %cst_23 {dimension_numbers = #tpu.dot_dimension_numbers<[1], [0], [0], [1], [0, 0, 1, 1], [], []>} : vector<8x64xbf16>, vector<64x256xbf16>, vector<8x256xf32> -> vector<8x256xf32>
    %45 = arith.truncf %21 : vector<8x64xf32> to vector<8x64xbf16>
    %cst_24 = arith.constant dense<0.000000e+00> : vector<8x256xf32>
    %46 = tpu.matmul %45, %3, %cst_24 {dimension_numbers = #tpu.dot_dimension_numbers<[1], [0], [0], [1], [0, 0, 1, 1], [], []>} : vector<8x64xbf16>, vector<64x256xbf16>, vector<8x256xf32> -> vector<8x256xf32>
    %47 = arith.addf %44, %46 : vector<8x256xf32>
    %48 = arith.addf %47, %11 : vector<8x256xf32>
    %49 = vector.extract_strided_slice %48 {offsets = [0, 0], sizes = [8, 192], strides = [1, 1]} : vector<8x256xf32> to vector<8x192xf32>
    %50 = arith.negf %49 : vector<8x192xf32>
    %51 = math.exp %50 : vector<8x192xf32>
    %cst_25 = arith.constant 1.000000e+00 : f32
    %52 = vector.broadcast %cst_25 : f32 to vector<8x192xf32>
    %53 = arith.addf %52, %51 : vector<8x192xf32>
    %54 = arith.divf %52, %53 : vector<8x192xf32>
    %55 = vector.extract_strided_slice %48 {offsets = [0, 192], sizes = [8, 64], strides = [1, 1]} : vector<8x256xf32> to vector<8x64xf32>
    %56 = math.tanh %55 : vector<8x64xf32>
    %57 = vector.extract_strided_slice %54 {offsets = [0, 0], sizes = [8, 64], strides = [1, 1]} : vector<8x192xf32> to vector<8x64xf32>
    %58 = vector.extract_strided_slice %54 {offsets = [0, 64], sizes = [8, 64], strides = [1, 1]} : vector<8x192xf32> to vector<8x64xf32>
    %59 = vector.extract_strided_slice %54 {offsets = [0, 128], sizes = [8, 64], strides = [1, 1]} : vector<8x192xf32> to vector<8x64xf32>
    %60 = arith.mulf %58, %21 : vector<8x64xf32>
    %61 = arith.mulf %57, %56 : vector<8x64xf32>
    %62 = arith.addf %60, %61 : vector<8x64xf32>
    %63 = math.tanh %62 : vector<8x64xf32>
    %64 = arith.mulf %59, %63 : vector<8x64xf32>
    %65 = arith.truncf %42 : vector<8x64xf32> to vector<8x64xbf16>
    %cst_26 = arith.constant dense<0.000000e+00> : vector<8x256xf32>
    %66 = tpu.matmul %65, %1, %cst_26 {dimension_numbers = #tpu.dot_dimension_numbers<[1], [0], [0], [1], [0, 0, 1, 1], [], []>} : vector<8x64xbf16>, vector<64x256xbf16>, vector<8x256xf32> -> vector<8x256xf32>
    %67 = vector.extract_strided_slice %20 {offsets = [1, 0, 0], sizes = [1, 8, 256], strides = [1, 1, 1]} : vector<8x8x256xf32> to vector<1x8x256xf32>
    %68 = vector.shape_cast %67 : vector<1x8x256xf32> to vector<8x256xf32>
    %69 = arith.addf %66, %68 : vector<8x256xf32>
    %70 = vector.extract_strided_slice %69 {offsets = [0, 0], sizes = [8, 192], strides = [1, 1]} : vector<8x256xf32> to vector<8x192xf32>
    %71 = arith.negf %70 : vector<8x192xf32>
    %72 = math.exp %71 : vector<8x192xf32>
    %cst_27 = arith.constant 1.000000e+00 : f32
    %73 = vector.broadcast %cst_27 : f32 to vector<8x192xf32>
    %74 = arith.addf %73, %72 : vector<8x192xf32>
    %75 = arith.divf %73, %74 : vector<8x192xf32>
    %76 = vector.extract_strided_slice %69 {offsets = [0, 192], sizes = [8, 64], strides = [1, 1]} : vector<8x256xf32> to vector<8x64xf32>
    %77 = math.tanh %76 : vector<8x64xf32>
    %78 = vector.extract_strided_slice %75 {offsets = [0, 0], sizes = [8, 64], strides = [1, 1]} : vector<8x192xf32> to vector<8x64xf32>
    %79 = vector.extract_strided_slice %75 {offsets = [0, 64], sizes = [8, 64], strides = [1, 1]} : vector<8x192xf32> to vector<8x64xf32>
    %80 = vector.extract_strided_slice %75 {offsets = [0, 128], sizes = [8, 64], strides = [1, 1]} : vector<8x192xf32> to vector<8x64xf32>
    %81 = arith.mulf %79, %40 : vector<8x64xf32>
    %82 = arith.mulf %78, %77 : vector<8x64xf32>
    %83 = arith.addf %81, %82 : vector<8x64xf32>
    %84 = math.tanh %83 : vector<8x64xf32>
    %85 = arith.mulf %80, %84 : vector<8x64xf32>
    %86 = arith.truncf %85 : vector<8x64xf32> to vector<8x64xbf16>
    %cst_28 = arith.constant dense<0.000000e+00> : vector<8x256xf32>
    %87 = tpu.matmul %86, %2, %cst_28 {dimension_numbers = #tpu.dot_dimension_numbers<[1], [0], [0], [1], [0, 0, 1, 1], [], []>} : vector<8x64xbf16>, vector<64x256xbf16>, vector<8x256xf32> -> vector<8x256xf32>
    %88 = arith.truncf %64 : vector<8x64xf32> to vector<8x64xbf16>
    %cst_29 = arith.constant dense<0.000000e+00> : vector<8x256xf32>
    %89 = tpu.matmul %88, %3, %cst_29 {dimension_numbers = #tpu.dot_dimension_numbers<[1], [0], [0], [1], [0, 0, 1, 1], [], []>} : vector<8x64xbf16>, vector<64x256xbf16>, vector<8x256xf32> -> vector<8x256xf32>
    %90 = arith.addf %87, %89 : vector<8x256xf32>
    %91 = arith.addf %90, %11 : vector<8x256xf32>
    %92 = vector.extract_strided_slice %91 {offsets = [0, 0], sizes = [8, 192], strides = [1, 1]} : vector<8x256xf32> to vector<8x192xf32>
    %93 = arith.negf %92 : vector<8x192xf32>
    %94 = math.exp %93 : vector<8x192xf32>
    %cst_30 = arith.constant 1.000000e+00 : f32
    %95 = vector.broadcast %cst_30 : f32 to vector<8x192xf32>
    %96 = arith.addf %95, %94 : vector<8x192xf32>
    %97 = arith.divf %95, %96 : vector<8x192xf32>
    %98 = vector.extract_strided_slice %91 {offsets = [0, 192], sizes = [8, 64], strides = [1, 1]} : vector<8x256xf32> to vector<8x64xf32>
    %99 = math.tanh %98 : vector<8x64xf32>
    %100 = vector.extract_strided_slice %97 {offsets = [0, 0], sizes = [8, 64], strides = [1, 1]} : vector<8x192xf32> to vector<8x64xf32>
    %101 = vector.extract_strided_slice %97 {offsets = [0, 64], sizes = [8, 64], strides = [1, 1]} : vector<8x192xf32> to vector<8x64xf32>
    %102 = vector.extract_strided_slice %97 {offsets = [0, 128], sizes = [8, 64], strides = [1, 1]} : vector<8x192xf32> to vector<8x64xf32>
    %103 = arith.mulf %101, %62 : vector<8x64xf32>
    %104 = arith.mulf %100, %99 : vector<8x64xf32>
    %105 = arith.addf %103, %104 : vector<8x64xf32>
    %106 = math.tanh %105 : vector<8x64xf32>
    %107 = arith.mulf %102, %106 : vector<8x64xf32>
    %108 = arith.truncf %85 : vector<8x64xf32> to vector<8x64xbf16>
    %cst_31 = arith.constant dense<0.000000e+00> : vector<8x256xf32>
    %109 = tpu.matmul %108, %1, %cst_31 {dimension_numbers = #tpu.dot_dimension_numbers<[1], [0], [0], [1], [0, 0, 1, 1], [], []>} : vector<8x64xbf16>, vector<64x256xbf16>, vector<8x256xf32> -> vector<8x256xf32>
    %110 = vector.extract_strided_slice %20 {offsets = [2, 0, 0], sizes = [1, 8, 256], strides = [1, 1, 1]} : vector<8x8x256xf32> to vector<1x8x256xf32>
    %111 = vector.shape_cast %110 : vector<1x8x256xf32> to vector<8x256xf32>
    %112 = arith.addf %109, %111 : vector<8x256xf32>
    %113 = vector.extract_strided_slice %112 {offsets = [0, 0], sizes = [8, 192], strides = [1, 1]} : vector<8x256xf32> to vector<8x192xf32>
    %114 = arith.negf %113 : vector<8x192xf32>
    %115 = math.exp %114 : vector<8x192xf32>
    %cst_32 = arith.constant 1.000000e+00 : f32
    %116 = vector.broadcast %cst_32 : f32 to vector<8x192xf32>
    %117 = arith.addf %116, %115 : vector<8x192xf32>
    %118 = arith.divf %116, %117 : vector<8x192xf32>
    %119 = vector.extract_strided_slice %112 {offsets = [0, 192], sizes = [8, 64], strides = [1, 1]} : vector<8x256xf32> to vector<8x64xf32>
    %120 = math.tanh %119 : vector<8x64xf32>
    %121 = vector.extract_strided_slice %118 {offsets = [0, 0], sizes = [8, 64], strides = [1, 1]} : vector<8x192xf32> to vector<8x64xf32>
    %122 = vector.extract_strided_slice %118 {offsets = [0, 64], sizes = [8, 64], strides = [1, 1]} : vector<8x192xf32> to vector<8x64xf32>
    %123 = vector.extract_strided_slice %118 {offsets = [0, 128], sizes = [8, 64], strides = [1, 1]} : vector<8x192xf32> to vector<8x64xf32>
    %124 = arith.mulf %122, %83 : vector<8x64xf32>
    %125 = arith.mulf %121, %120 : vector<8x64xf32>
    %126 = arith.addf %124, %125 : vector<8x64xf32>
    %127 = math.tanh %126 : vector<8x64xf32>
    %128 = arith.mulf %123, %127 : vector<8x64xf32>
    %129 = arith.truncf %128 : vector<8x64xf32> to vector<8x64xbf16>
    %cst_33 = arith.constant dense<0.000000e+00> : vector<8x256xf32>
    %130 = tpu.matmul %129, %2, %cst_33 {dimension_numbers = #tpu.dot_dimension_numbers<[1], [0], [0], [1], [0, 0, 1, 1], [], []>} : vector<8x64xbf16>, vector<64x256xbf16>, vector<8x256xf32> -> vector<8x256xf32>
    %131 = arith.truncf %107 : vector<8x64xf32> to vector<8x64xbf16>
    %cst_34 = arith.constant dense<0.000000e+00> : vector<8x256xf32>
    %132 = tpu.matmul %131, %3, %cst_34 {dimension_numbers = #tpu.dot_dimension_numbers<[1], [0], [0], [1], [0, 0, 1, 1], [], []>} : vector<8x64xbf16>, vector<64x256xbf16>, vector<8x256xf32> -> vector<8x256xf32>
    %133 = arith.addf %130, %132 : vector<8x256xf32>
    %134 = arith.addf %133, %11 : vector<8x256xf32>
    %135 = vector.extract_strided_slice %134 {offsets = [0, 0], sizes = [8, 192], strides = [1, 1]} : vector<8x256xf32> to vector<8x192xf32>
    %136 = arith.negf %135 : vector<8x192xf32>
    %137 = math.exp %136 : vector<8x192xf32>
    %cst_35 = arith.constant 1.000000e+00 : f32
    %138 = vector.broadcast %cst_35 : f32 to vector<8x192xf32>
    %139 = arith.addf %138, %137 : vector<8x192xf32>
    %140 = arith.divf %138, %139 : vector<8x192xf32>
    %141 = vector.extract_strided_slice %134 {offsets = [0, 192], sizes = [8, 64], strides = [1, 1]} : vector<8x256xf32> to vector<8x64xf32>
    %142 = math.tanh %141 : vector<8x64xf32>
    %143 = vector.extract_strided_slice %140 {offsets = [0, 0], sizes = [8, 64], strides = [1, 1]} : vector<8x192xf32> to vector<8x64xf32>
    %144 = vector.extract_strided_slice %140 {offsets = [0, 64], sizes = [8, 64], strides = [1, 1]} : vector<8x192xf32> to vector<8x64xf32>
    %145 = vector.extract_strided_slice %140 {offsets = [0, 128], sizes = [8, 64], strides = [1, 1]} : vector<8x192xf32> to vector<8x64xf32>
    %146 = arith.mulf %144, %105 : vector<8x64xf32>
    %147 = arith.mulf %143, %142 : vector<8x64xf32>
    %148 = arith.addf %146, %147 : vector<8x64xf32>
    %149 = math.tanh %148 : vector<8x64xf32>
    %150 = arith.mulf %145, %149 : vector<8x64xf32>
    %151 = arith.truncf %128 : vector<8x64xf32> to vector<8x64xbf16>
    %cst_36 = arith.constant dense<0.000000e+00> : vector<8x256xf32>
    %152 = tpu.matmul %151, %1, %cst_36 {dimension_numbers = #tpu.dot_dimension_numbers<[1], [0], [0], [1], [0, 0, 1, 1], [], []>} : vector<8x64xbf16>, vector<64x256xbf16>, vector<8x256xf32> -> vector<8x256xf32>
    %153 = vector.extract_strided_slice %20 {offsets = [3, 0, 0], sizes = [1, 8, 256], strides = [1, 1, 1]} : vector<8x8x256xf32> to vector<1x8x256xf32>
    %154 = vector.shape_cast %153 : vector<1x8x256xf32> to vector<8x256xf32>
    %155 = arith.addf %152, %154 : vector<8x256xf32>
    %156 = vector.extract_strided_slice %155 {offsets = [0, 0], sizes = [8, 192], strides = [1, 1]} : vector<8x256xf32> to vector<8x192xf32>
    %157 = arith.negf %156 : vector<8x192xf32>
    %158 = math.exp %157 : vector<8x192xf32>
    %cst_37 = arith.constant 1.000000e+00 : f32
    %159 = vector.broadcast %cst_37 : f32 to vector<8x192xf32>
    %160 = arith.addf %159, %158 : vector<8x192xf32>
    %161 = arith.divf %159, %160 : vector<8x192xf32>
    %162 = vector.extract_strided_slice %155 {offsets = [0, 192], sizes = [8, 64], strides = [1, 1]} : vector<8x256xf32> to vector<8x64xf32>
    %163 = math.tanh %162 : vector<8x64xf32>
    %164 = vector.extract_strided_slice %161 {offsets = [0, 0], sizes = [8, 64], strides = [1, 1]} : vector<8x192xf32> to vector<8x64xf32>
    %165 = vector.extract_strided_slice %161 {offsets = [0, 64], sizes = [8, 64], strides = [1, 1]} : vector<8x192xf32> to vector<8x64xf32>
    %166 = vector.extract_strided_slice %161 {offsets = [0, 128], sizes = [8, 64], strides = [1, 1]} : vector<8x192xf32> to vector<8x64xf32>
    %167 = arith.mulf %165, %126 : vector<8x64xf32>
    %168 = arith.mulf %164, %163 : vector<8x64xf32>
    %169 = arith.addf %167, %168 : vector<8x64xf32>
    %170 = math.tanh %169 : vector<8x64xf32>
    %171 = arith.mulf %166, %170 : vector<8x64xf32>
    %172 = arith.truncf %171 : vector<8x64xf32> to vector<8x64xbf16>
    %cst_38 = arith.constant dense<0.000000e+00> : vector<8x256xf32>
    %173 = tpu.matmul %172, %2, %cst_38 {dimension_numbers = #tpu.dot_dimension_numbers<[1], [0], [0], [1], [0, 0, 1, 1], [], []>} : vector<8x64xbf16>, vector<64x256xbf16>, vector<8x256xf32> -> vector<8x256xf32>
    %174 = arith.truncf %150 : vector<8x64xf32> to vector<8x64xbf16>
    %cst_39 = arith.constant dense<0.000000e+00> : vector<8x256xf32>
    %175 = tpu.matmul %174, %3, %cst_39 {dimension_numbers = #tpu.dot_dimension_numbers<[1], [0], [0], [1], [0, 0, 1, 1], [], []>} : vector<8x64xbf16>, vector<64x256xbf16>, vector<8x256xf32> -> vector<8x256xf32>
    %176 = arith.addf %173, %175 : vector<8x256xf32>
    %177 = arith.addf %176, %11 : vector<8x256xf32>
    %178 = vector.extract_strided_slice %177 {offsets = [0, 0], sizes = [8, 192], strides = [1, 1]} : vector<8x256xf32> to vector<8x192xf32>
    %179 = arith.negf %178 : vector<8x192xf32>
    %180 = math.exp %179 : vector<8x192xf32>
    %cst_40 = arith.constant 1.000000e+00 : f32
    %181 = vector.broadcast %cst_40 : f32 to vector<8x192xf32>
    %182 = arith.addf %181, %180 : vector<8x192xf32>
    %183 = arith.divf %181, %182 : vector<8x192xf32>
    %184 = vector.extract_strided_slice %177 {offsets = [0, 192], sizes = [8, 64], strides = [1, 1]} : vector<8x256xf32> to vector<8x64xf32>
    %185 = math.tanh %184 : vector<8x64xf32>
    %186 = vector.extract_strided_slice %183 {offsets = [0, 0], sizes = [8, 64], strides = [1, 1]} : vector<8x192xf32> to vector<8x64xf32>
    %187 = vector.extract_strided_slice %183 {offsets = [0, 64], sizes = [8, 64], strides = [1, 1]} : vector<8x192xf32> to vector<8x64xf32>
    %188 = vector.extract_strided_slice %183 {offsets = [0, 128], sizes = [8, 64], strides = [1, 1]} : vector<8x192xf32> to vector<8x64xf32>
    %189 = arith.mulf %187, %148 : vector<8x64xf32>
    %190 = arith.mulf %186, %185 : vector<8x64xf32>
    %191 = arith.addf %189, %190 : vector<8x64xf32>
    %192 = math.tanh %191 : vector<8x64xf32>
    %193 = arith.mulf %188, %192 : vector<8x64xf32>
    %194 = arith.truncf %171 : vector<8x64xf32> to vector<8x64xbf16>
    %cst_41 = arith.constant dense<0.000000e+00> : vector<8x256xf32>
    %195 = tpu.matmul %194, %1, %cst_41 {dimension_numbers = #tpu.dot_dimension_numbers<[1], [0], [0], [1], [0, 0, 1, 1], [], []>} : vector<8x64xbf16>, vector<64x256xbf16>, vector<8x256xf32> -> vector<8x256xf32>
    %196 = vector.extract_strided_slice %20 {offsets = [4, 0, 0], sizes = [1, 8, 256], strides = [1, 1, 1]} : vector<8x8x256xf32> to vector<1x8x256xf32>
    %197 = vector.shape_cast %196 : vector<1x8x256xf32> to vector<8x256xf32>
    %198 = arith.addf %195, %197 : vector<8x256xf32>
    %199 = vector.extract_strided_slice %198 {offsets = [0, 0], sizes = [8, 192], strides = [1, 1]} : vector<8x256xf32> to vector<8x192xf32>
    %200 = arith.negf %199 : vector<8x192xf32>
    %201 = math.exp %200 : vector<8x192xf32>
    %cst_42 = arith.constant 1.000000e+00 : f32
    %202 = vector.broadcast %cst_42 : f32 to vector<8x192xf32>
    %203 = arith.addf %202, %201 : vector<8x192xf32>
    %204 = arith.divf %202, %203 : vector<8x192xf32>
    %205 = vector.extract_strided_slice %198 {offsets = [0, 192], sizes = [8, 64], strides = [1, 1]} : vector<8x256xf32> to vector<8x64xf32>
    %206 = math.tanh %205 : vector<8x64xf32>
    %207 = vector.extract_strided_slice %204 {offsets = [0, 0], sizes = [8, 64], strides = [1, 1]} : vector<8x192xf32> to vector<8x64xf32>
    %208 = vector.extract_strided_slice %204 {offsets = [0, 64], sizes = [8, 64], strides = [1, 1]} : vector<8x192xf32> to vector<8x64xf32>
    %209 = vector.extract_strided_slice %204 {offsets = [0, 128], sizes = [8, 64], strides = [1, 1]} : vector<8x192xf32> to vector<8x64xf32>
    %210 = arith.mulf %208, %169 : vector<8x64xf32>
    %211 = arith.mulf %207, %206 : vector<8x64xf32>
    %212 = arith.addf %210, %211 : vector<8x64xf32>
    %213 = math.tanh %212 : vector<8x64xf32>
    %214 = arith.mulf %209, %213 : vector<8x64xf32>
    %215 = arith.truncf %214 : vector<8x64xf32> to vector<8x64xbf16>
    %cst_43 = arith.constant dense<0.000000e+00> : vector<8x256xf32>
    %216 = tpu.matmul %215, %2, %cst_43 {dimension_numbers = #tpu.dot_dimension_numbers<[1], [0], [0], [1], [0, 0, 1, 1], [], []>} : vector<8x64xbf16>, vector<64x256xbf16>, vector<8x256xf32> -> vector<8x256xf32>
    %217 = arith.truncf %193 : vector<8x64xf32> to vector<8x64xbf16>
    %cst_44 = arith.constant dense<0.000000e+00> : vector<8x256xf32>
    %218 = tpu.matmul %217, %3, %cst_44 {dimension_numbers = #tpu.dot_dimension_numbers<[1], [0], [0], [1], [0, 0, 1, 1], [], []>} : vector<8x64xbf16>, vector<64x256xbf16>, vector<8x256xf32> -> vector<8x256xf32>
    %219 = arith.addf %216, %218 : vector<8x256xf32>
    %220 = arith.addf %219, %11 : vector<8x256xf32>
    %221 = vector.extract_strided_slice %220 {offsets = [0, 0], sizes = [8, 192], strides = [1, 1]} : vector<8x256xf32> to vector<8x192xf32>
    %222 = arith.negf %221 : vector<8x192xf32>
    %223 = math.exp %222 : vector<8x192xf32>
    %cst_45 = arith.constant 1.000000e+00 : f32
    %224 = vector.broadcast %cst_45 : f32 to vector<8x192xf32>
    %225 = arith.addf %224, %223 : vector<8x192xf32>
    %226 = arith.divf %224, %225 : vector<8x192xf32>
    %227 = vector.extract_strided_slice %220 {offsets = [0, 192], sizes = [8, 64], strides = [1, 1]} : vector<8x256xf32> to vector<8x64xf32>
    %228 = math.tanh %227 : vector<8x64xf32>
    %229 = vector.extract_strided_slice %226 {offsets = [0, 0], sizes = [8, 64], strides = [1, 1]} : vector<8x192xf32> to vector<8x64xf32>
    %230 = vector.extract_strided_slice %226 {offsets = [0, 64], sizes = [8, 64], strides = [1, 1]} : vector<8x192xf32> to vector<8x64xf32>
    %231 = vector.extract_strided_slice %226 {offsets = [0, 128], sizes = [8, 64], strides = [1, 1]} : vector<8x192xf32> to vector<8x64xf32>
    %232 = arith.mulf %230, %191 : vector<8x64xf32>
    %233 = arith.mulf %229, %228 : vector<8x64xf32>
    %234 = arith.addf %232, %233 : vector<8x64xf32>
    %235 = math.tanh %234 : vector<8x64xf32>
    %236 = arith.mulf %231, %235 : vector<8x64xf32>
    %237 = arith.truncf %214 : vector<8x64xf32> to vector<8x64xbf16>
    %cst_46 = arith.constant dense<0.000000e+00> : vector<8x256xf32>
    %238 = tpu.matmul %237, %1, %cst_46 {dimension_numbers = #tpu.dot_dimension_numbers<[1], [0], [0], [1], [0, 0, 1, 1], [], []>} : vector<8x64xbf16>, vector<64x256xbf16>, vector<8x256xf32> -> vector<8x256xf32>
    %239 = vector.extract_strided_slice %20 {offsets = [5, 0, 0], sizes = [1, 8, 256], strides = [1, 1, 1]} : vector<8x8x256xf32> to vector<1x8x256xf32>
    %240 = vector.shape_cast %239 : vector<1x8x256xf32> to vector<8x256xf32>
    %241 = arith.addf %238, %240 : vector<8x256xf32>
    %242 = vector.extract_strided_slice %241 {offsets = [0, 0], sizes = [8, 192], strides = [1, 1]} : vector<8x256xf32> to vector<8x192xf32>
    %243 = arith.negf %242 : vector<8x192xf32>
    %244 = math.exp %243 : vector<8x192xf32>
    %cst_47 = arith.constant 1.000000e+00 : f32
    %245 = vector.broadcast %cst_47 : f32 to vector<8x192xf32>
    %246 = arith.addf %245, %244 : vector<8x192xf32>
    %247 = arith.divf %245, %246 : vector<8x192xf32>
    %248 = vector.extract_strided_slice %241 {offsets = [0, 192], sizes = [8, 64], strides = [1, 1]} : vector<8x256xf32> to vector<8x64xf32>
    %249 = math.tanh %248 : vector<8x64xf32>
    %250 = vector.extract_strided_slice %247 {offsets = [0, 0], sizes = [8, 64], strides = [1, 1]} : vector<8x192xf32> to vector<8x64xf32>
    %251 = vector.extract_strided_slice %247 {offsets = [0, 64], sizes = [8, 64], strides = [1, 1]} : vector<8x192xf32> to vector<8x64xf32>
    %252 = vector.extract_strided_slice %247 {offsets = [0, 128], sizes = [8, 64], strides = [1, 1]} : vector<8x192xf32> to vector<8x64xf32>
    %253 = arith.mulf %251, %212 : vector<8x64xf32>
    %254 = arith.mulf %250, %249 : vector<8x64xf32>
    %255 = arith.addf %253, %254 : vector<8x64xf32>
    %256 = math.tanh %255 : vector<8x64xf32>
    %257 = arith.mulf %252, %256 : vector<8x64xf32>
    %258 = arith.truncf %257 : vector<8x64xf32> to vector<8x64xbf16>
    %cst_48 = arith.constant dense<0.000000e+00> : vector<8x256xf32>
    %259 = tpu.matmul %258, %2, %cst_48 {dimension_numbers = #tpu.dot_dimension_numbers<[1], [0], [0], [1], [0, 0, 1, 1], [], []>} : vector<8x64xbf16>, vector<64x256xbf16>, vector<8x256xf32> -> vector<8x256xf32>
    %260 = arith.truncf %236 : vector<8x64xf32> to vector<8x64xbf16>
    %cst_49 = arith.constant dense<0.000000e+00> : vector<8x256xf32>
    %261 = tpu.matmul %260, %3, %cst_49 {dimension_numbers = #tpu.dot_dimension_numbers<[1], [0], [0], [1], [0, 0, 1, 1], [], []>} : vector<8x64xbf16>, vector<64x256xbf16>, vector<8x256xf32> -> vector<8x256xf32>
    %262 = arith.addf %259, %261 : vector<8x256xf32>
    %263 = arith.addf %262, %11 : vector<8x256xf32>
    %264 = vector.extract_strided_slice %263 {offsets = [0, 0], sizes = [8, 192], strides = [1, 1]} : vector<8x256xf32> to vector<8x192xf32>
    %265 = arith.negf %264 : vector<8x192xf32>
    %266 = math.exp %265 : vector<8x192xf32>
    %cst_50 = arith.constant 1.000000e+00 : f32
    %267 = vector.broadcast %cst_50 : f32 to vector<8x192xf32>
    %268 = arith.addf %267, %266 : vector<8x192xf32>
    %269 = arith.divf %267, %268 : vector<8x192xf32>
    %270 = vector.extract_strided_slice %263 {offsets = [0, 192], sizes = [8, 64], strides = [1, 1]} : vector<8x256xf32> to vector<8x64xf32>
    %271 = math.tanh %270 : vector<8x64xf32>
    %272 = vector.extract_strided_slice %269 {offsets = [0, 0], sizes = [8, 64], strides = [1, 1]} : vector<8x192xf32> to vector<8x64xf32>
    %273 = vector.extract_strided_slice %269 {offsets = [0, 64], sizes = [8, 64], strides = [1, 1]} : vector<8x192xf32> to vector<8x64xf32>
    %274 = vector.extract_strided_slice %269 {offsets = [0, 128], sizes = [8, 64], strides = [1, 1]} : vector<8x192xf32> to vector<8x64xf32>
    %275 = arith.mulf %273, %234 : vector<8x64xf32>
    %276 = arith.mulf %272, %271 : vector<8x64xf32>
    %277 = arith.addf %275, %276 : vector<8x64xf32>
    %278 = math.tanh %277 : vector<8x64xf32>
    %279 = arith.mulf %274, %278 : vector<8x64xf32>
    %280 = arith.truncf %257 : vector<8x64xf32> to vector<8x64xbf16>
    %cst_51 = arith.constant dense<0.000000e+00> : vector<8x256xf32>
    %281 = tpu.matmul %280, %1, %cst_51 {dimension_numbers = #tpu.dot_dimension_numbers<[1], [0], [0], [1], [0, 0, 1, 1], [], []>} : vector<8x64xbf16>, vector<64x256xbf16>, vector<8x256xf32> -> vector<8x256xf32>
    %282 = vector.extract_strided_slice %20 {offsets = [6, 0, 0], sizes = [1, 8, 256], strides = [1, 1, 1]} : vector<8x8x256xf32> to vector<1x8x256xf32>
    %283 = vector.shape_cast %282 : vector<1x8x256xf32> to vector<8x256xf32>
    %284 = arith.addf %281, %283 : vector<8x256xf32>
    %285 = vector.extract_strided_slice %284 {offsets = [0, 0], sizes = [8, 192], strides = [1, 1]} : vector<8x256xf32> to vector<8x192xf32>
    %286 = arith.negf %285 : vector<8x192xf32>
    %287 = math.exp %286 : vector<8x192xf32>
    %cst_52 = arith.constant 1.000000e+00 : f32
    %288 = vector.broadcast %cst_52 : f32 to vector<8x192xf32>
    %289 = arith.addf %288, %287 : vector<8x192xf32>
    %290 = arith.divf %288, %289 : vector<8x192xf32>
    %291 = vector.extract_strided_slice %284 {offsets = [0, 192], sizes = [8, 64], strides = [1, 1]} : vector<8x256xf32> to vector<8x64xf32>
    %292 = math.tanh %291 : vector<8x64xf32>
    %293 = vector.extract_strided_slice %290 {offsets = [0, 0], sizes = [8, 64], strides = [1, 1]} : vector<8x192xf32> to vector<8x64xf32>
    %294 = vector.extract_strided_slice %290 {offsets = [0, 64], sizes = [8, 64], strides = [1, 1]} : vector<8x192xf32> to vector<8x64xf32>
    %295 = vector.extract_strided_slice %290 {offsets = [0, 128], sizes = [8, 64], strides = [1, 1]} : vector<8x192xf32> to vector<8x64xf32>
    %296 = arith.mulf %294, %255 : vector<8x64xf32>
    %297 = arith.mulf %293, %292 : vector<8x64xf32>
    %298 = arith.addf %296, %297 : vector<8x64xf32>
    %299 = math.tanh %298 : vector<8x64xf32>
    %300 = arith.mulf %295, %299 : vector<8x64xf32>
    %301 = arith.truncf %300 : vector<8x64xf32> to vector<8x64xbf16>
    %cst_53 = arith.constant dense<0.000000e+00> : vector<8x256xf32>
    %302 = tpu.matmul %301, %2, %cst_53 {dimension_numbers = #tpu.dot_dimension_numbers<[1], [0], [0], [1], [0, 0, 1, 1], [], []>} : vector<8x64xbf16>, vector<64x256xbf16>, vector<8x256xf32> -> vector<8x256xf32>
    %303 = arith.truncf %279 : vector<8x64xf32> to vector<8x64xbf16>
    %cst_54 = arith.constant dense<0.000000e+00> : vector<8x256xf32>
    %304 = tpu.matmul %303, %3, %cst_54 {dimension_numbers = #tpu.dot_dimension_numbers<[1], [0], [0], [1], [0, 0, 1, 1], [], []>} : vector<8x64xbf16>, vector<64x256xbf16>, vector<8x256xf32> -> vector<8x256xf32>
    %305 = arith.addf %302, %304 : vector<8x256xf32>
    %306 = arith.addf %305, %11 : vector<8x256xf32>
    %307 = vector.extract_strided_slice %306 {offsets = [0, 0], sizes = [8, 192], strides = [1, 1]} : vector<8x256xf32> to vector<8x192xf32>
    %308 = arith.negf %307 : vector<8x192xf32>
    %309 = math.exp %308 : vector<8x192xf32>
    %cst_55 = arith.constant 1.000000e+00 : f32
    %310 = vector.broadcast %cst_55 : f32 to vector<8x192xf32>
    %311 = arith.addf %310, %309 : vector<8x192xf32>
    %312 = arith.divf %310, %311 : vector<8x192xf32>
    %313 = vector.extract_strided_slice %306 {offsets = [0, 192], sizes = [8, 64], strides = [1, 1]} : vector<8x256xf32> to vector<8x64xf32>
    %314 = math.tanh %313 : vector<8x64xf32>
    %315 = vector.extract_strided_slice %312 {offsets = [0, 0], sizes = [8, 64], strides = [1, 1]} : vector<8x192xf32> to vector<8x64xf32>
    %316 = vector.extract_strided_slice %312 {offsets = [0, 64], sizes = [8, 64], strides = [1, 1]} : vector<8x192xf32> to vector<8x64xf32>
    %317 = vector.extract_strided_slice %312 {offsets = [0, 128], sizes = [8, 64], strides = [1, 1]} : vector<8x192xf32> to vector<8x64xf32>
    %318 = arith.mulf %316, %277 : vector<8x64xf32>
    %319 = arith.mulf %315, %314 : vector<8x64xf32>
    %320 = arith.addf %318, %319 : vector<8x64xf32>
    %321 = math.tanh %320 : vector<8x64xf32>
    %322 = arith.mulf %317, %321 : vector<8x64xf32>
    %323 = arith.truncf %300 : vector<8x64xf32> to vector<8x64xbf16>
    %cst_56 = arith.constant dense<0.000000e+00> : vector<8x256xf32>
    %324 = tpu.matmul %323, %1, %cst_56 {dimension_numbers = #tpu.dot_dimension_numbers<[1], [0], [0], [1], [0, 0, 1, 1], [], []>} : vector<8x64xbf16>, vector<64x256xbf16>, vector<8x256xf32> -> vector<8x256xf32>
    %325 = vector.extract_strided_slice %20 {offsets = [7, 0, 0], sizes = [1, 8, 256], strides = [1, 1, 1]} : vector<8x8x256xf32> to vector<1x8x256xf32>
    %326 = vector.shape_cast %325 : vector<1x8x256xf32> to vector<8x256xf32>
    %327 = arith.addf %324, %326 : vector<8x256xf32>
    %328 = vector.extract_strided_slice %327 {offsets = [0, 0], sizes = [8, 192], strides = [1, 1]} : vector<8x256xf32> to vector<8x192xf32>
    %329 = arith.negf %328 : vector<8x192xf32>
    %330 = math.exp %329 : vector<8x192xf32>
    %cst_57 = arith.constant 1.000000e+00 : f32
    %331 = vector.broadcast %cst_57 : f32 to vector<8x192xf32>
    %332 = arith.addf %331, %330 : vector<8x192xf32>
    %333 = arith.divf %331, %332 : vector<8x192xf32>
    %334 = vector.extract_strided_slice %327 {offsets = [0, 192], sizes = [8, 64], strides = [1, 1]} : vector<8x256xf32> to vector<8x64xf32>
    %335 = math.tanh %334 : vector<8x64xf32>
    %336 = vector.extract_strided_slice %333 {offsets = [0, 0], sizes = [8, 64], strides = [1, 1]} : vector<8x192xf32> to vector<8x64xf32>
    %337 = vector.extract_strided_slice %333 {offsets = [0, 64], sizes = [8, 64], strides = [1, 1]} : vector<8x192xf32> to vector<8x64xf32>
    %338 = vector.extract_strided_slice %333 {offsets = [0, 128], sizes = [8, 64], strides = [1, 1]} : vector<8x192xf32> to vector<8x64xf32>
    %339 = arith.mulf %337, %298 : vector<8x64xf32>
    %340 = arith.mulf %336, %335 : vector<8x64xf32>
    %341 = arith.addf %339, %340 : vector<8x64xf32>
    %342 = math.tanh %341 : vector<8x64xf32>
    %343 = arith.mulf %338, %342 : vector<8x64xf32>
    %344 = arith.truncf %343 : vector<8x64xf32> to vector<8x64xbf16>
    %cst_58 = arith.constant dense<0.000000e+00> : vector<8x256xf32>
    %345 = tpu.matmul %344, %2, %cst_58 {dimension_numbers = #tpu.dot_dimension_numbers<[1], [0], [0], [1], [0, 0, 1, 1], [], []>} : vector<8x64xbf16>, vector<64x256xbf16>, vector<8x256xf32> -> vector<8x256xf32>
    %346 = arith.truncf %322 : vector<8x64xf32> to vector<8x64xbf16>
    %cst_59 = arith.constant dense<0.000000e+00> : vector<8x256xf32>
    %347 = tpu.matmul %346, %3, %cst_59 {dimension_numbers = #tpu.dot_dimension_numbers<[1], [0], [0], [1], [0, 0, 1, 1], [], []>} : vector<8x64xbf16>, vector<64x256xbf16>, vector<8x256xf32> -> vector<8x256xf32>
    %348 = arith.addf %345, %347 : vector<8x256xf32>
    %349 = arith.addf %348, %11 : vector<8x256xf32>
    %350 = vector.extract_strided_slice %349 {offsets = [0, 0], sizes = [8, 192], strides = [1, 1]} : vector<8x256xf32> to vector<8x192xf32>
    %351 = arith.negf %350 : vector<8x192xf32>
    %352 = math.exp %351 : vector<8x192xf32>
    %cst_60 = arith.constant 1.000000e+00 : f32
    %353 = vector.broadcast %cst_60 : f32 to vector<8x192xf32>
    %354 = arith.addf %353, %352 : vector<8x192xf32>
    %355 = arith.divf %353, %354 : vector<8x192xf32>
    %356 = vector.extract_strided_slice %349 {offsets = [0, 192], sizes = [8, 64], strides = [1, 1]} : vector<8x256xf32> to vector<8x64xf32>
    %357 = math.tanh %356 : vector<8x64xf32>
    %358 = vector.extract_strided_slice %355 {offsets = [0, 0], sizes = [8, 64], strides = [1, 1]} : vector<8x192xf32> to vector<8x64xf32>
    %359 = vector.extract_strided_slice %355 {offsets = [0, 64], sizes = [8, 64], strides = [1, 1]} : vector<8x192xf32> to vector<8x64xf32>
    %360 = vector.extract_strided_slice %355 {offsets = [0, 128], sizes = [8, 64], strides = [1, 1]} : vector<8x192xf32> to vector<8x64xf32>
    %361 = arith.mulf %359, %320 : vector<8x64xf32>
    %362 = arith.mulf %358, %357 : vector<8x64xf32>
    %363 = arith.addf %361, %362 : vector<8x64xf32>
    %364 = math.tanh %363 : vector<8x64xf32>
    %365 = arith.mulf %360, %364 : vector<8x64xf32>
    %c7 = arith.constant 7 : index
    %c0_61 = arith.constant 0 : index
    %c0_62 = arith.constant 0 : index
    %366 = vector.load %arg0[%c7, %c0_61, %c0_62] : memref<8x8x16xbf16, #tpu.memory_space<vmem>>, vector<1x8x16xbf16>
    %367 = vector.shape_cast %366 : vector<1x8x16xbf16> to vector<8x16xbf16>
    %cst_63 = arith.constant dense<0.000000e+00> : vector<8x32xf32>
    %368 = tpu.matmul %367, %4, %cst_63 {dimension_numbers = #tpu.dot_dimension_numbers<[1], [0], [0], [1], [0, 0, 1, 1], [], []>} : vector<8x16xbf16>, vector<16x32xbf16>, vector<8x32xf32> -> vector<8x32xf32>
    %369 = vector.broadcast %12 : vector<1x32xf32> to vector<8x32xf32>
    %370 = arith.addf %368, %369 : vector<8x32xf32>
    %cst_64 = arith.constant 0.000000e+00 : f32
    %371 = vector.broadcast %cst_64 : f32 to vector<8x32xf32>
    %372 = arith.maximumf %370, %371 : vector<8x32xf32>
    %373 = arith.truncf %372 : vector<8x32xf32> to vector<8x32xbf16>
    %cst_65 = arith.constant dense<0.000000e+00> : vector<8x32xf32>
    %374 = tpu.matmul %373, %5, %cst_65 {dimension_numbers = #tpu.dot_dimension_numbers<[1], [0], [0], [1], [0, 0, 1, 1], [], []>} : vector<8x32xbf16>, vector<32x32xbf16>, vector<8x32xf32> -> vector<8x32xf32>
    %375 = vector.broadcast %13 : vector<1x32xf32> to vector<8x32xf32>
    %376 = arith.addf %374, %375 : vector<8x32xf32>
    %cst_66 = arith.constant 0.000000e+00 : f32
    %377 = vector.broadcast %cst_66 : f32 to vector<8x32xf32>
    %378 = arith.maximumf %376, %377 : vector<8x32xf32>
    %379 = arith.truncf %365 : vector<8x64xf32> to vector<8x64xbf16>
    %cst_67 = arith.constant dense<0.000000e+00> : vector<8x2xf32>
    %380 = tpu.matmul %379, %6, %cst_67 {dimension_numbers = #tpu.dot_dimension_numbers<[1], [0], [0], [1], [0, 0, 1, 1], [], []>} : vector<8x64xbf16>, vector<64x2xbf16>, vector<8x2xf32> -> vector<8x2xf32>
    %381 = arith.truncf %378 : vector<8x32xf32> to vector<8x32xbf16>
    %cst_68 = arith.constant dense<0.000000e+00> : vector<8x2xf32>
    %382 = tpu.matmul %381, %7, %cst_68 {dimension_numbers = #tpu.dot_dimension_numbers<[1], [0], [0], [1], [0, 0, 1, 1], [], []>} : vector<8x32xbf16>, vector<32x2xbf16>, vector<8x2xf32> -> vector<8x2xf32>
    %383 = arith.addf %380, %382 : vector<8x2xf32>
    %384 = vector.broadcast %14 : vector<1x2xf32> to vector<8x2xf32>
    %385 = arith.addf %383, %384 : vector<8x2xf32>
    %386 = tpu.iota {dimensions = array<i32: 1>} : vector<8x2xi32>
    %c0_i32 = arith.constant 0 : i32
    %387 = vector.broadcast %c0_i32 : i32 to vector<8x2xi32>
    %388 = arith.cmpi eq, %386, %387 : vector<8x2xi32>
    %389 = arith.negf %385 : vector<8x2xf32>
    %390 = math.exp %389 : vector<8x2xf32>
    %cst_69 = arith.constant 1.000000e+00 : f32
    %391 = vector.broadcast %cst_69 : f32 to vector<8x2xf32>
    %392 = arith.addf %391, %390 : vector<8x2xf32>
    %393 = arith.divf %391, %392 : vector<8x2xf32>
    %394 = arith.select %388, %385, %393 : vector<8x2xi1>, vector<8x2xf32>
    %c0_70 = arith.constant 0 : index
    %c0_71 = arith.constant 0 : index
    %395 = vector.load %arg5[%c0_70, %c0_71] : memref<8x2xf32, #tpu.memory_space<vmem>>, vector<8x2xf32>
    tpu.vector_store %arg5[%c0_70, %c0_71], %394 {strides = array<i32>} : memref<8x2xf32, #tpu.memory_space<vmem>>, vector<8x2xf32>,
    return
  }
}

</mosaic_0001>

<bundles_post_ra>
// kernel: ensemble_margin_forward.1
= control target key start
LH: loop header
LB: loop body
LE: loop exit
PB: predicated region body
PF: predicated region fallthrough
CT: control target
= control target key end

     0   :  { %10 = vsyncpa [#allocation3], 0  ;;  %s2596_s21 = smov [#allocation2]   ;;  %s2597_s23 = smov 128   ;;  %s3236_s0 = inlined_call_operand.vmem [shape: bf16[8,8,16], index: 0, kind: input, shape index: {}]   ;;  %s3237_s1 = inlined_call_operand.hbm [shape: bf16[208,256], index: 1, kind: input, shape index: {}]   ;;  %s3238_s2 = inlined_call_operand.vmem [shape: bf16[48,32], index: 2, kind: input, shape index: {}]   ;;  %s3239_s3 = inlined_call_operand.vmem [shape: bf16[96,2], index: 3, kind: input, shape index: {}]   ;;  %s3240_s4 = inlined_call_operand.vmem [shape: f32[8,256], index: 4, kind: input, shape index: {}]   ;;  %s3241_s5 = inlined_call_operand.vmem [shape: f32[8,2], index: 5, kind: output, shape index: {}]  }
   0x1   :  { %s17_s20 = sshll.u32 %s3237_s1, 4  ;;  %s19_s22 = sshll.u32 %s2596_s21, 4  ;;  %s18_s20 = int_to_ptr.hbm [resolvable:$true] %s17_s20  ;;  %s20_s22 = int_to_ptr.vmem [resolvable:$true] %s19_s22 }
   0x2   :  { %s2598_s24 = smov 8  }
   0x3   :  { %25 = dma.hbm_to_vmem [thread:$0]  %s18_s20, 3328, %s20_s22, [#allocation3], %s2597_s23, %s2597_s23, %s2598_s24  }
   0x4   :  { %2594 = dma.done.wait [#allocation3], 3328  }
   0x5   :  { %2595 = vsyncadd [#allocation3], 4294963968  ;;  %v2338_v0 = vld [vmem:[#allocation2 + $0x44] sm:$0xf]  ;;  %v2144_v1 = vld [vmem:[#allocation2 + $0x48] sm:$0xf0] }
   0x6   :  { %v2336_v2 = vld [vmem:[#allocation2 + $0x34] sm:$0xf]  ;;  %v2634_v3 = vor.u32 %v2338_v0, %v2144_v1  ;;  %v2136_v4 = vld [vmem:[#allocation2 + $0x38] sm:$0xf0]  ;;  %v2330_v5 = vld [vmem:[#allocation2 + $0x4] sm:$0xf] }
   0x7   :  { %v2104_v6 = vld [vmem:[#allocation2 + $0x8] sm:$0xf0]  ;;  %v2637_v8 = vor.u32 %v2336_v2, %v2136_v4  ;;  %v2365_v9 = vld [vmem:[%s3236_s0] sm:$0xff]  ;;  %vm135_vm0 = vcmask 130048   ;;  %v2339_v13 = vld [vmem:[#allocation2 + $0x44] sm:$0xf0] }
   0x8   :  { %v2107_v7 = vor.u32 %v2330_v5, %v2104_v6  ;;  %267 = vmatpush.bf16.msra.mxu3 %v2634_v3  ;;  %v2142_v10 = vld [vmem:[#allocation2 + $0x40] sm:$0xf]  ;;  %v2334_v11 = vld [vmem:[#allocation2 + $0x24] sm:$0xf]  ;;  %v2128_v12 = vld [vmem:[#allocation2 + $0x28] sm:$0xf0] }
   0x9   :  { %v2642_v14 = vor.u32 %v2339_v13, %v2142_v10  ;;  %v2134_v15 = vld [vmem:[#allocation2 + $0x30] sm:$0xf]  ;;  %v2337_v16 = vld [vmem:[#allocation2 + $0x34] sm:$0xf0]  ;;  %v2102_v17 = vld [vmem:[#allocation2] sm:$0xf]  ;;  %v2645_v19 = vor.u32 %v2334_v11, %v2128_v12 }
   0xa   :  { %184 = vmatpush.bf16.msra.mxu1 %v2107_v7  ;;  %v2331_v18 = vld [vmem:[#allocation2 + $0x4] sm:$0xf0]  ;;  %v2332_v21 = vld [vmem:[#allocation2 + $0x14] sm:$0xf]  ;;  %v2120_v22 = vld [vmem:[#allocation2 + $0x18] sm:$0xf0]  ;;  %v2649_v23 = vor.u32 %v2337_v16, %v2134_v15 }
   0xb   :  { %v2103_v20 = vor.u32 %v2331_v18, %v2102_v17  ;;  %254 = vmatpush.bf16.msra.mxu2 %v2642_v14  ;;  %v2126_v24 = vld [vmem:[#allocation2 + $0x20] sm:$0xf]  ;;  %v2335_v25 = vld [vmem:[#allocation2 + $0x24] sm:$0xf0]  ;;  %v2652_v26 = vor.u32 %v2332_v21, %v2120_v22  ;;  %v2118_v28 = vld [vmem:[#allocation2 + $0x10] sm:$0xf] }
   0xc   :  { %268 = vmatpush.bf16.msra.mxu3 %v2637_v8  ;;  %v2655_v27 = vor.u32 %v2335_v25, %v2126_v24  ;;  %v2333_v29 = vld [vmem:[#allocation2 + $0x14] sm:$0xf0]  ;;  %v2599_v31 = vmov 0   ;;  %v81_v32 = vld [vmem:[%s3240_s4] ss:$8 sm:$0x3] }
   0xd   :  { %2112 = vmatmul.msk.bf16.vlgmr.msra.gmra.mxu1 %vm135_vm0, %v2365_v9  ;;  %155 = vmatpush.bf16.msra.mxu0 %v2103_v20  ;;  %v2660_v30 = vor.u32 %v2333_v29, %v2118_v28  ;;  %v2668_v33 = vperm.slane %v81_v32, 1  ;;  %s2600_s28 = smov 64   ;;  %v2675_v42 = vperm.slane %v81_v32, 0  ;;  %v2354_v61 = vld [vmem:[#allocation2 + $0xc4] sm:$0xf]  ;;  %vm246_vm9 = vcmask 523264  }
   0xe   :  { %v2178_v62 = vld [vmem:[#allocation2 + $0xc8] sm:$0xf0]  ;;  %v2352_v63 = vld [vmem:[#allocation2 + $0xb4] sm:$0xf]  ;;  %v2170_v1 = vld [vmem:[#allocation2 + $0xb8] sm:$0xf0] }
   0xf   :  { %255 = vmatpush.bf16.msra.mxu2 %v2649_v23  ;;  %v2682_v0 = vor.u32 %v2354_v61, %v2178_v62  ;;  %v2176_v2 = vld [vmem:[#allocation2 + $0xc0] sm:$0xf]  ;;  %v2355_v4 = vld [vmem:[#allocation2 + $0xc4] sm:$0xf0]  ;;  %v2168_v6 = vld [vmem:[#allocation2 + $0xb0] sm:$0xf]  ;;  %v2687_v7 = vor.u32 %v2352_v63, %v2170_v1 }
  0x10   :  { %269 = vmatpush.bf16.msra.mxu3 %v2645_v19  ;;  %2108 = vmatmul.msk.bf16.vlgmr.msra.gmra.mxu0 %vm135_vm0, %v2365_v9  ;;  %v2684_v5 = vor.u32 %v2355_v4, %v2176_v2  ;;  %v2353_v9 = vld [vmem:[#allocation2 + $0xb4] sm:$0xf0]  ;;  %v2350_v10 = vld [vmem:[#allocation2 + $0xa4] sm:$0xf]  ;;  %v2162_v11 = vld [vmem:[#allocation2 + $0xa8] sm:$0xf0] }
  0x11   :  { %630 = vmatpush.bf16.msrb.mxu1 %v2682_v0  ;;  %v2691_v12 = vor.u32 %v2353_v9, %v2168_v6  ;;  %v2160_v13 = vld [vmem:[#allocation2 + $0xa0] sm:$0xf]  ;;  %v2351_v15 = vld [vmem:[#allocation2 + $0xa4] sm:$0xf0]  ;;  %v2695_v16 = vor.u32 %v2350_v10, %v2162_v11  ;;  %v2348_v17 = vld [vmem:[#allocation2 + $0x94] sm:$0xf] }
  0x12   :  { %617 = vmatpush.bf16.msrb.mxu0 %v2684_v5  ;;  %v2154_v18 = vld [vmem:[#allocation2 + $0x98] sm:$0xf0]  ;;  %v2699_v20 = vor.u32 %v2351_v15, %v2160_v13  ;;  %v2152_v21 = vld [vmem:[#allocation2 + $0x90] sm:$0xf]  ;;  %v2349_v22 = vld [vmem:[#allocation2 + $0x94] sm:$0xf0] }
  0x13   :  { %256 = vmatpush.bf16.msra.mxu2 %v2655_v27  ;;  %v2346_v24 = vld [vmem:[#allocation2 + $0x84] sm:$0xf]  ;;  %v2210_v25 = vld [vmem:[#allocation2 + $0x88] sm:$0xf0]  ;;  %v2208_v28 = vld [vmem:[#allocation2 + $0x80] sm:$0xf]  ;;  %v2703_v32 = vor.u32 %v2348_v17, %v2154_v18 }
  0x14   :  { %270 = vmatpush.bf16.msra.mxu3 %v2652_v26  ;;  %v2347_v29 = vld [vmem:[#allocation2 + $0x84] sm:$0xf0]  ;;  %v2341_v61 = vld [vmem:[#allocation2 + $0x54] sm:$0xf0] }
  0x15   :  { %631 = vmatpush.bf16.msrb.mxu1 %v2687_v7 }
  0x16   :  { %618 = vmatpush.bf16.msrb.mxu0 %v2691_v12 }
  0x17   :  { %271 = vmatmul.bf16.vlgmr.msra.gmra.mxu3 %v2599_v31  ;;  %257 = vmatpush.bf16.msra.mxu2 %v2660_v30 }
  0x18   :  { %390 = vmatpush.bf16.msrb.mxu3 %v2682_v0 }
  0x19   :  { %632 = vmatpush.bf16.msrb.mxu1 %v2695_v16 }
  0x1a   :  { %258 = vmatmul.bf16.vlgmr.msra.gmra.mxu2 %v2599_v31  ;;  %619 = vmatpush.bf16.msrb.mxu0 %v2699_v20 }
  0x1b   :  { %377 = vmatpush.bf16.msrb.mxu2 %v2684_v5 }
  0x1c   :  { %391 = vmatpush.bf16.msrb.mxu3 %v2687_v7 }
  0x1d   :  { %633 = vmatpush.bf16.msrb.mxu1 %v2703_v32 }
  0x1f   :  { %378 = vmatpush.bf16.msrb.mxu2 %v2691_v12 }
  0x20   :  { %392 = vmatpush.bf16.msrb.mxu3 %v2695_v16 }
  0x21   :  { %743 = vmatpush.bf16.msra.mxu1 %v2634_v3 }
  0x23   :  { %379 = vmatpush.bf16.msrb.mxu2 %v2699_v20 }
  0x24   :  { %393 = vmatpush.bf16.msrb.mxu3 %v2703_v32 }
  0x25   :  { %744 = vmatpush.bf16.msra.mxu1 %v2637_v8 }
  0x27   :  { %394 = vmatmul.bf16.vlgmr.msrb.gmra.mxu3 %v2599_v31 }
  0x29   :  { %745 = vmatpush.bf16.msra.mxu1 %v2645_v19 }
  0x2d   :  { %746 = vmatpush.bf16.msra.mxu1 %v2652_v26 }
  0x8a   :  { %v186_v34 = vpop.f32.mrf.mxu1 }
  0x8b   :  { %v187_v35 = vadd.f32 %v186_v34, %v2668_v33  ;;  %v2707_v34 = vor.u32 %v2349_v22, %v2152_v21 }
  0x8d   :  { %v157_v43 = vpop.f32.mrf.mxu0  ;;  %380 = vmatpush.bf16.msrb.mxu2 %v2707_v34  ;;  %620 = vmatpush.bf16.msrb.mxu0 %v2707_v34 }
  0x8e   :  { %v158_v44 = vadd.f32 %v157_v43, %v2675_v42 }
  0x90   :  { %381 = vmatmul.bf16.vlgmr.msrb.gmra.mxu2 %v2599_v31 }
  0x91   :  { %730 = vmatpush.bf16.msra.mxu0 %v2642_v14 }
  0x95   :  { %731 = vmatpush.bf16.msra.mxu0 %v2649_v23 }
  0x99   :  { %732 = vmatpush.bf16.msra.mxu0 %v2655_v27 }
  0x9a   :  { %v272_v36 = vpop.f32.mrf.mxu3 }
  0x9b   :  { %v2671_v37 = vadd.f32 %v272_v36, %v187_v35  ;;  %v2709_v35 = vor.u32 %v2346_v24, %v2210_v25  ;;  %v2712_v36 = vor.u32 %v2347_v29, %v2208_v28  ;;  %v2083_v28 = vld [vmem:[%s3240_s4 + $0x1] ss:$8 sm:$0x3] }
  0x9c   :  { %v2785_v29 = vperm.slane %v2083_v28, 1 }
  0x9d   :  { %2374 = vtanh.f32 %v2671_v37  ;;  %v259_v38 = vpop.f32.mrf.mxu2  ;;  %459 = vmatpush.bf16.msra.mxu3 %v2709_v35  ;;  %446 = vmatpush.bf16.msra.mxu2 %v2712_v36 }
  0x9e   :  { %v260_v45 = vadd.f32 %v259_v38, %v158_v44  ;;  %v2344_v38 = vld [vmem:[#allocation2 + $0x74] sm:$0xf]  ;;  %733 = vmatpush.bf16.msra.mxu0 %v2660_v30 }
  0xa0   :  { %v2148_v46 = vmul.f32 -1.442695, %v260_v45  ;;  %v2342_v45 = vld [vmem:[#allocation2 + $0x64] sm:$0xf] }
  0xa2   :  { %v274_v39 = vpop.f32.mrf.mxu3  ;;  %2376 = vpow2.f32 %v2148_v46  ;;  %v2194_v46 = vld [vmem:[#allocation2 + $0x68] sm:$0xf0] }
  0xa3   :  { %v2375_v40 = vpop.eup %2374  ;;  %v2202_v39 = vld [vmem:[#allocation2 + $0x78] sm:$0xf0] }
  0xa4   :  { %317 = vrot.lane.b32.xlu0 %v2375_v40, %s2600_s28  ;;  %v2200_v40 = vld [vmem:[#allocation2 + $0x70] sm:$0xf]  ;;  %v2718_v43 = vor.u32 %v2344_v38, %v2202_v39 }
  0xa5   :  { %v261_v41 = vpop.f32.mrf.mxu2 }
  0xa6   :  { %v2345_v41 = vld [vmem:[#allocation2 + $0x74] sm:$0xf0]  ;;  %460 = vmatpush.bf16.msra.mxu3 %v2718_v43 }
  0xa7   :  { %v2721_v44 = vor.u32 %v2345_v41, %v2200_v40 }
  0xa8   :  { %v2377_v47 = vpop.eup %2376 }
  0xa9   :  { %v282_v48 = vadd.f32 1.0, %v2377_v47  ;;  %v2192_v47 = vld [vmem:[#allocation2 + $0x60] sm:$0xf]  ;;  %447 = vmatpush.bf16.msra.mxu2 %v2721_v44 }
  0xaa   :  { %v395_v21 = vpop.f32.mrf.mxu3 }
  0xab   :  { %2378 = vrcp.f32 %v282_v48  ;;  %vm289_vm1 = vweird.f32 %v282_v48  ;;  %v295_v53 = vand.u32 2147483648, %v282_v48  ;;  %v293_v55 = vand.u32 2147483647, %v282_v48 }
  0xad   :  { %v296_v56 = vor.u32 1.1754944e-38, %v295_v53  ;;  %vm294_vm4 = vcmp.eq.f32.partialorder %v293_v55, 8.507059e+37 }
  0xb1   :  { %v2379_v49 = vpop.eup %2378 }
  0xb2   :  { %v285_v50 = vmul.f32 %v2379_v49, %v282_v48  ;;  %vm290_vm2 = vweird.f32 %v2379_v49  ;;  %v2343_v48 = vld [vmem:[#allocation2 + $0x64] sm:$0xf0]  ;;  %v397_v24 = vpop.f32.mrf.mxu3 }
  0xb3   :  { %vm291_vm3 = vmor %vm289_vm1, %vm290_vm2 }
  0xb4   :  { %v286_v51 = vsub.f32 1.0, %v285_v50 }
  0xb6   :  { %v287_v52 = vmul.f32 %v2379_v49, %v286_v51  ;;  %v2733_v51 = vor.u32 %v2343_v48, %v2192_v47  ;;  %v188_v48 = vpop.f32.mrf.mxu1 }
  0xb8   :  { %v288_v54 = vadd.f32 %v2379_v49, %v287_v52  ;;  %448 = vmatpush.bf16.msra.mxu2 %v2733_v51 }
  0xba   :  { %v292_v57 = vsel %vm291_vm3, %v2379_v49, %v288_v54  ;;  %v2729_v49 = vor.u32 %v2342_v45, %v2194_v46  ;;  %v2149_v54 = vmul.f32 -1.442695, %v2671_v37 }
  0xbb   :  { %v2678_v58 = vsel %vm294_vm4, %v296_v56, %v292_v57  ;;  %v2340_v56 = vld [vmem:[#allocation2 + $0x54] sm:$0xf]  ;;  %v2186_v57 = vld [vmem:[#allocation2 + $0x58] sm:$0xf0] }
  0xbc   :  { %v315_v50 = vmul.f32 0.0, %v2678_v58  ;;  %461 = vmatpush.bf16.msra.mxu3 %v2729_v49 }
 0x113   :  { %v382_v22 = vpop.f32.mrf.mxu2 }
 0x116   :  { %v318_v59 = vpop.permute.xlu0 %317 }
 0x117   :  { %v320_v60 = vmul.f32 %v318_v59, %v2678_v58  ;;  %v2184_v58 = vld [vmem:[#allocation2 + $0x50] sm:$0xf] }
 0x118   :  { %v2750_v62 = vor.u32 %v2341_v61, %v2184_v58  ;;  %v2797_v58 = vperm.slane %v2083_v28, 0 }
 0x119   :  { %322 = vrot.lane.b32.xlu0 %v320_v60, %s2600_s28  ;;  %v2748_v60 = vor.u32 %v2340_v56, %v2186_v57 }
 0x11a   :  { %449 = vmatpush.bf16.msra.mxu2 %v2750_v62 }
 0x11b   :  { %462 = vmatpush.bf16.msra.mxu3 %v2748_v60  ;;  %v384_v25 = vpop.f32.mrf.mxu2 }
 0x11e   :  { %530 = vmatpush.bf16.msrb.mxu2 %v2642_v14 }
 0x11f   :  { %543 = vmatpush.bf16.msrb.mxu3 %v2634_v3 }
 0x122   :  { %531 = vmatpush.bf16.msrb.mxu2 %v2649_v23 }
 0x123   :  { %544 = vmatpush.bf16.msrb.mxu3 %v2637_v8 }
 0x126   :  { %532 = vmatpush.bf16.msrb.mxu2 %v2655_v27 }
 0x127   :  { %545 = vmatpush.bf16.msrb.mxu3 %v2645_v19 }
 0x12a   :  { %533 = vmatpush.bf16.msrb.mxu2 %v2660_v30 }
 0x12b   :  { %546 = vmatpush.bf16.msrb.mxu3 %v2652_v26 }
 0x18b   :  { %v323_v52 = vpop.permute.xlu0 %322 }
 0x18c   :  { %v2736_v53 = vadd.f32 %v323_v52, %v315_v50  ;;  %v189_v50 = vadd.f32 %v188_v48, %v2668_v33 }
 0x18e   :  { %2380 = vtanh.f32 %v2736_v53 }
 0x18f   :  { %2382 = vpow2.f32 %v2149_v54 }
 0x194   :  { %v2381_v31 = vpop.eup %2380 }
 0x195   :  { %328 = vrot.lane.b32.xlu1 %v2381_v31, %s2600_s28  ;;  %v2383_v55 = vpop.eup %2382 }
 0x196   :  { %v283_v59 = vadd.f32 1.0, %v2383_v55 }
 0x198   :  { %2384 = vrcp.f32 %v283_v59  ;;  %v310_v6 = vand.u32 2147483648, %v283_v59  ;;  %vm304_vm6 = vweird.f32 %v283_v59  ;;  %v308_v9 = vand.u32 2147483647, %v283_v59 }
 0x19a   :  { %v311_v11 = vor.u32 1.1754944e-38, %v310_v6  ;;  %vm309_vm8 = vcmp.eq.f32.partialorder %v308_v9, 8.507059e+37  ;;  %v159_v6 = vpop.f32.mrf.mxu0 }
 0x19e   :  { %v2385_v37 = vpop.eup %2384 }
 0x19f   :  { %v300_v63 = vmul.f32 %v2385_v37, %v283_v59  ;;  %vm305_vm5 = vweird.f32 %v2385_v37 }
 0x1a0   :  { %vm306_vm7 = vmor %vm304_vm6, %vm305_vm5 }
 0x1a1   :  { %v301_v1 = vsub.f32 1.0, %v300_v63 }
 0x1a3   :  { %v302_v2 = vmul.f32 %v2385_v37, %v301_v1 }
 0x1a5   :  { %v303_v4 = vadd.f32 %v2385_v37, %v302_v2 }
 0x1a7   :  { %v307_v10 = vsel %vm306_vm7, %v2385_v37, %v303_v4 }
 0x1a8   :  { %v312_v15 = vsel %vm309_vm8, %v311_v11, %v307_v10  ;;  %v160_v10 = vadd.f32 %v159_v6, %v2675_v42 }
 0x207   :  { %v329_v13 = vpop.permute.xlu1 %328 }
 0x208   :  { %v331_v17 = vmul.f32 %v329_v13, %v312_v15 }
 0x20a   :  { %v332_v18 = vpack.c.bf16 %v331_v17, %v331_v17 }
 0x20c   :  { %2214 = vmatmul.msk.bf16.vlgmr.msra.gmra.mxu2 %vm246_vm9, %v332_v18  ;;  %2215 = vmatmul.msk.bf16.vlgmr.msra.gmra.mxu3 %vm246_vm9, %v332_v18 }
 0x20d   :  { %659 = vmatpush.bf16.msra.mxu3 %v2709_v35  ;;  %646 = vmatpush.bf16.msra.mxu2 %v2712_v36 }
 0x211   :  { %660 = vmatpush.bf16.msra.mxu3 %v2718_v43  ;;  %647 = vmatpush.bf16.msra.mxu2 %v2721_v44 }
 0x215   :  { %661 = vmatpush.bf16.msra.mxu3 %v2729_v49  ;;  %648 = vmatpush.bf16.msra.mxu2 %v2733_v51 }
 0x219   :  { %662 = vmatpush.bf16.msra.mxu3 %v2748_v60  ;;  %649 = vmatpush.bf16.msra.mxu2 %v2750_v62 }
 0x21c   :  { %2218 = vmatmul.msk.bf16.vlgmr.msrb.gmra.mxu2 %vm246_vm9, %v332_v18  ;;  %2219 = vmatmul.msk.bf16.vlgmr.msrb.gmra.mxu3 %vm246_vm9, %v332_v18 }
 0x21d   :  { %830 = vmatpush.bf16.msrb.mxu3 %v2682_v0  ;;  %817 = vmatpush.bf16.msrb.mxu2 %v2684_v5 }
 0x221   :  { %831 = vmatpush.bf16.msrb.mxu3 %v2687_v7  ;;  %818 = vmatpush.bf16.msrb.mxu2 %v2691_v12 }
 0x225   :  { %832 = vmatpush.bf16.msrb.mxu3 %v2695_v16  ;;  %819 = vmatpush.bf16.msrb.mxu2 %v2699_v20 }
 0x229   :  { %833 = vmatpush.bf16.msrb.mxu3 %v2703_v32  ;;  %820 = vmatpush.bf16.msrb.mxu2 %v2707_v34 }
 0x28f   :  { %v451_v38 = vpop.f32.mrf.mxu2  ;;  %v464_v39 = vpop.f32.mrf.mxu3 }
 0x290   :  { %v465_v40 = vadd.f32 %v464_v39, %v395_v21  ;;  %v452_v59 = vadd.f32 %v451_v38, %v382_v22 }
 0x292   :  { %v2788_v41 = vadd.f32 %v465_v40, %v2785_v29  ;;  %v468_v61 = vadd.f32 %v452_v59, %v2797_v58 }
 0x294   :  { %2386 = vtanh.f32 %v2788_v41  ;;  %v2216_v37 = vmul.f32 -1.442695, %v468_v61 }
 0x297   :  { %v453_v45 = vpop.f32.mrf.mxu2  ;;  %v466_v46 = vpop.f32.mrf.mxu3 }
 0x29a   :  { %v2387_v47 = vpop.eup %2386 }
 0x29b   :  { %511 = vrot.lane.b32.xlu2 %v2387_v47, %s2600_s28 }
 0x29f   :  { %v535_v52 = vpop.f32.mrf.mxu2  ;;  %v548_v31 = vpop.f32.mrf.mxu3 }
 0x2a0   :  { %v2793_v54 = vadd.f32 %v548_v31, %v189_v50  ;;  %v536_v11 = vadd.f32 %v535_v52, %v160_v10 }
 0x2a2   :  { %2388 = vtanh.f32 %v2793_v54  ;;  %v2220_v15 = vmul.f32 -1.442695, %v536_v11 }
 0x2a3   :  { %2390 = vpow2.f32 %v2216_v37  ;;  %v2366_v37 = vld [vmem:[%s3236_s0 + $0x8] sm:$0xff] }
 0x2a4   :  { %2109 = vmatmul.msk.bf16.gmra.mxu0 %vm135_vm0, %v2366_v37  ;;  %2113 = vmatmul.msk.bf16.gmra.mxu1 %vm135_vm0, %v2366_v37 }
 0x2a7   :  { %v537_v55 = vpop.f32.mrf.mxu2  ;;  %v550_v56 = vpop.f32.mrf.mxu3 }
 0x2a8   :  { %v2389_v57 = vpop.eup %2388 }
 0x2a9   :  { %593 = vrot.lane.b32.xlu1 %v2389_v57, %s2600_s28  ;;  %v2391_v63 = vpop.eup %2390 }
 0x2aa   :  { %v476_v1 = vadd.f32 1.0, %v2391_v63 }
 0x2ac   :  { %2392 = vrcp.f32 %v476_v1  ;;  %v489_v18 = vand.u32 2147483648, %v476_v1  ;;  %vm483_vm11 = vweird.f32 %v476_v1  ;;  %v487_v21 = vand.u32 2147483647, %v476_v1 }
 0x2ad   :  { %2394 = vpow2.f32 %v2220_v15 }
 0x2ae   :  { %v490_v24 = vor.u32 1.1754944e-38, %v489_v18  ;;  %vm488_vm13 = vcmp.eq.f32.partialorder %v487_v21, 8.507059e+37 }
 0x2b2   :  { %v2393_v2 = vpop.eup %2392 }
 0x2b3   :  { %v479_v4 = vmul.f32 %v2393_v2, %v476_v1  ;;  %vm484_vm10 = vweird.f32 %v2393_v2  ;;  %v2395_v39 = vpop.eup %2394 }
 0x2b4   :  { %vm485_vm12 = vmor %vm483_vm11, %vm484_vm10  ;;  %v558_v40 = vadd.f32 1.0, %v2395_v39 }
 0x2b5   :  { %v480_v9 = vsub.f32 1.0, %v479_v4  ;;  %v2367_v4 = vld [vmem:[%s3236_s0 + $0x10] sm:$0xff] }
 0x2b6   :  { %2396 = vrcp.f32 %v558_v40  ;;  %v571_v52 = vand.u32 2147483648, %v558_v40  ;;  %vm565_vm15 = vweird.f32 %v558_v40  ;;  %v569_v31 = vand.u32 2147483647, %v558_v40  ;;  %2110 = vmatmul.msk.bf16.gmra.mxu0 %vm135_vm0, %v2367_v4  ;;  %2114 = vmatmul.msk.bf16.gmra.mxu1 %vm135_vm0, %v2367_v4 }
 0x2b7   :  { %v481_v13 = vmul.f32 %v2393_v2, %v480_v9 }
 0x2b8   :  { %v572_v56 = vor.u32 1.1754944e-38, %v571_v52  ;;  %vm570_vm2 = vcmp.eq.f32.partialorder %v569_v31, 8.507059e+37 }
 0x2b9   :  { %v482_v17 = vadd.f32 %v2393_v2, %v481_v13  ;;  %v2368_v13 = vld [vmem:[%s3236_s0 + $0x18] sm:$0xff] }
 0x2bb   :  { %v486_v22 = vsel %vm485_vm12, %v2393_v2, %v482_v17  ;;  %v2217_v17 = vmul.f32 -1.442695, %v2788_v41 }
 0x2bc   :  { %v491_v28 = vsel %vm488_vm13, %v490_v24, %v486_v22  ;;  %v2397_v45 = vpop.eup %2396 }
 0x2bd   :  { %v561_v46 = vmul.f32 %v2397_v45, %v558_v40  ;;  %vm566_vm14 = vweird.f32 %v2397_v45  ;;  %v509_v63 = vmul.f32 0.0, %v491_v28 }
 0x2be   :  { %vm567_vm1 = vmor %vm565_vm15, %vm566_vm14 }
 0x2bf   :  { %v562_v47 = vsub.f32 1.0, %v561_v46 }
 0x2c1   :  { %v563_v48 = vmul.f32 %v2397_v45, %v562_v47 }
 0x2c3   :  { %v564_v50 = vadd.f32 %v2397_v45, %v563_v48 }
 0x2c5   :  { %v568_v55 = vsel %vm567_vm1, %v2397_v45, %v564_v50 }
 0x2c6   :  { %v573_v59 = vsel %vm570_vm2, %v572_v56, %v568_v55  ;;  %2111 = vmatmul.msk.bf16.gmra.mxu0 %vm135_vm0, %v2368_v13  ;;  %2115 = vmatmul.msk.bf16.gmra.mxu1 %vm135_vm0, %v2368_v13 }
 0x2c7   :  { %v591_v9 = vmul.f32 %v573_v59, %v2736_v53 }
 0x2f5   :  { %v512_v25 = vpop.permute.xlu2 %511 }
 0x2f6   :  { %v514_v38 = vmul.f32 %v512_v25, %v491_v28  ;;  %v2221_v28 = vmul.f32 -1.442695, %v2793_v54 }
 0x2f8   :  { %516 = vrot.lane.b32.xlu0 %v514_v38, %s2600_s28 }
 0x31b   :  { %v594_v57 = vpop.permute.xlu1 %593 }
 0x31c   :  { %v596_v61 = vmul.f32 %v594_v57, %v573_v59 }
 0x31e   :  { %598 = vrot.lane.b32.xlu2 %v596_v61, %s2600_s28 }
 0x321   :  { %v162_v13 = vpop.f32.mrf.mxu0 }
 0x36a   :  { %v517_v1 = vpop.permute.xlu0 %516 }
 0x36b   :  { %v2808_v2 = vadd.f32 %v517_v1, %v509_v63 }
 0x36d   :  { %2398 = vtanh.f32 %v2808_v2 }
 0x373   :  { %v2399_v6 = vpop.eup %2398 }
 0x374   :  { %522 = vrot.lane.b32.xlu2 %v2399_v6, %s2600_s28 }
 0x378   :  { %v599_v10 = vpop.permute.xlu2 %598 }
 0x379   :  { %v2818_v11 = vadd.f32 %v599_v10, %v591_v9 }
 0x37b   :  { %2400 = vtanh.f32 %v2818_v11 }
 0x37c   :  { %2402 = vpow2.f32 %v2217_v17  ;;  %v2859_v17 = vpop.f32.mrf.mxu0 }
 0x381   :  { %v2401_v15 = vpop.eup %2400 }
 0x382   :  { %604 = vrot.lane.b32.xlu1 %v2401_v15, %s2600_s28  ;;  %v2403_v53 = vpop.eup %2402  ;;  %v191_v15 = vpop.f32.mrf.mxu1 }
 0x383   :  { %v477_v18 = vadd.f32 1.0, %v2403_v53 }
 0x385   :  { %2404 = vrcp.f32 %v477_v18  ;;  %v504_v39 = vand.u32 2147483648, %v477_v18  ;;  %vm498_vm4 = vweird.f32 %v477_v18  ;;  %v502_v40 = vand.u32 2147483647, %v477_v18 }
 0x386   :  { %2406 = vpow2.f32 %v2221_v28 }
 0x387   :  { %v505_v46 = vor.u32 1.1754944e-38, %v504_v39  ;;  %vm503_vm6 = vcmp.eq.f32.partialorder %v502_v40, 8.507059e+37 }
 0x38a   :  { %v2861_v53 = vpop.f32.mrf.mxu1 }
 0x38b   :  { %v2405_v21 = vpop.eup %2404 }
 0x38c   :  { %v494_v22 = vmul.f32 %v2405_v21, %v477_v18  ;;  %vm499_vm3 = vweird.f32 %v2405_v21  ;;  %v2407_v50 = vpop.eup %2406  ;;  %v2863_v18 = vpop.f32.mrf.mxu0 }
 0x38d   :  { %vm500_vm5 = vmor %vm498_vm4, %vm499_vm3  ;;  %v559_v54 = vadd.f32 1.0, %v2407_v50 }
 0x38e   :  { %v495_v24 = vsub.f32 1.0, %v494_v22 }
 0x38f   :  { %2408 = vrcp.f32 %v559_v54  ;;  %v586_v61 = vand.u32 2147483648, %v559_v54  ;;  %vm580_vm8 = vweird.f32 %v559_v54  ;;  %v584_v37 = vand.u32 2147483647, %v559_v54 }
 0x390   :  { %v496_v25 = vmul.f32 %v2405_v21, %v495_v24 }
 0x391   :  { %v587_v1 = vor.u32 1.1754944e-38, %v586_v61  ;;  %vm585_vm11 = vcmp.eq.f32.partialorder %v584_v37, 8.507059e+37 }
 0x392   :  { %v497_v38 = vadd.f32 %v2405_v21, %v496_v25 }
 0x394   :  { %v501_v45 = vsel %vm500_vm5, %v2405_v21, %v497_v38  ;;  %v2865_v21 = vpop.f32.mrf.mxu1  ;;  %v2867_v22 = vpop.f32.mrf.mxu0 }
 0x395   :  { %v506_v41 = vsel %vm503_vm6, %v505_v46, %v501_v45  ;;  %v2409_v31 = vpop.eup %2408 }
 0x396   :  { %v576_v55 = vmul.f32 %v2409_v31, %v559_v54  ;;  %vm581_vm7 = vweird.f32 %v2409_v31 }
 0x397   :  { %vm582_vm10 = vmor %vm580_vm8, %vm581_vm7 }
 0x398   :  { %v577_v56 = vsub.f32 1.0, %v576_v55 }
 0x39a   :  { %v578_v57 = vmul.f32 %v2409_v31, %v577_v56 }
 0x39c   :  { %v579_v59 = vadd.f32 %v2409_v31, %v578_v57  ;;  %v2869_v24 = vpop.f32.mrf.mxu1  ;;  %v2871_v25 = vpop.f32.mrf.mxu0 }
 0x39e   :  { %v583_v63 = vsel %vm582_vm10, %v2409_v31, %v579_v59 }
 0x39f   :  { %v588_v4 = vsel %vm585_vm11, %v587_v1, %v583_v63 }
 0x3a4   :  { %v2873_v28 = vpop.f32.mrf.mxu1  ;;  %v2875_v38 = vpop.f32.mrf.mxu0 }
 0x3ac   :  { %v2877_v39 = vpop.f32.mrf.mxu1 }
 0x3ce   :  { %v523_v47 = vpop.permute.xlu2 %522 }
 0x3cf   :  { %v525_v48 = vmul.f32 %v523_v47, %v506_v41  ;;  %v163_v47 = vadd.f32 %v162_v13, %v2675_v42 }
 0x3d1   :  { %v609_v52 = vpack.c.bf16 %v525_v48, %v525_v48  ;;  %v192_v48 = vadd.f32 %v191_v15, %v2668_v33 }
 0x3d3   :  { %2222 = vmatmul.msk.bf16.vlgmr.msrb.gmra.mxu0 %vm246_vm9, %v609_v52  ;;  %2223 = vmatmul.msk.bf16.vlgmr.msrb.gmra.mxu1 %vm246_vm9, %v609_v52 }
 0x3d4   :  { %846 = vmatpush.bf16.msrb.mxu0 %v2712_v36  ;;  %859 = vmatpush.bf16.msrb.mxu1 %v2709_v35 }
 0x3d8   :  { %847 = vmatpush.bf16.msrb.mxu0 %v2721_v44  ;;  %860 = vmatpush.bf16.msrb.mxu1 %v2718_v43 }
 0x3dc   :  { %848 = vmatpush.bf16.msrb.mxu0 %v2733_v51  ;;  %861 = vmatpush.bf16.msrb.mxu1 %v2729_v49 }
 0x3e0   :  { %849 = vmatpush.bf16.msrb.mxu0 %v2750_v62  ;;  %862 = vmatpush.bf16.msrb.mxu1 %v2748_v60 }
 0x3f4   :  { %v605_v6 = vpop.permute.xlu1 %604 }
 0x3f5   :  { %v607_v9 = vmul.f32 %v605_v6, %v588_v4 }
 0x3f7   :  { %v608_v10 = vpack.c.bf16 %v607_v9, %v607_v9 }
 0x3f9   :  { %2224 = vmatmul.msk.bf16.vlgmr.msra.gmra.mxu2 %vm246_vm9, %v608_v10  ;;  %2225 = vmatmul.msk.bf16.vlgmr.msra.gmra.mxu3 %vm246_vm9, %v608_v10 }
 0x3fa   :  { %2228 = vmatmul.msk.bf16.vlgmr.msra.gmra.mxu0 %vm246_vm9, %v608_v10  ;;  %2229 = vmatmul.msk.bf16.vlgmr.msra.gmra.mxu1 %vm246_vm9, %v608_v10 }
 0x3fb   :  { %943 = vmatpush.bf16.msra.mxu3 %v2634_v3  ;;  %930 = vmatpush.bf16.msra.mxu2 %v2642_v14 }
 0x3fc   :  { %1017 = vmatpush.bf16.msra.mxu0 %v2684_v5  ;;  %1030 = vmatpush.bf16.msra.mxu1 %v2682_v0 }
 0x3ff   :  { %944 = vmatpush.bf16.msra.mxu3 %v2637_v8  ;;  %931 = vmatpush.bf16.msra.mxu2 %v2649_v23 }
 0x400   :  { %1018 = vmatpush.bf16.msra.mxu0 %v2691_v12  ;;  %1031 = vmatpush.bf16.msra.mxu1 %v2687_v7 }
 0x403   :  { %945 = vmatpush.bf16.msra.mxu3 %v2645_v19  ;;  %932 = vmatpush.bf16.msra.mxu2 %v2655_v27 }
 0x404   :  { %1019 = vmatpush.bf16.msra.mxu0 %v2699_v20  ;;  %1032 = vmatpush.bf16.msra.mxu1 %v2695_v16 }
 0x407   :  { %946 = vmatpush.bf16.msra.mxu3 %v2652_v26  ;;  %933 = vmatpush.bf16.msra.mxu2 %v2660_v30 }
 0x408   :  { %1020 = vmatpush.bf16.msra.mxu0 %v2707_v34  ;;  %1033 = vmatpush.bf16.msra.mxu1 %v2703_v32 }
 0x450   :  { %v622_v40 = vpop.f32.mrf.mxu0  ;;  %v635_v45 = vpop.f32.mrf.mxu1 }
 0x458   :  { %v624_v46 = vpop.f32.mrf.mxu0  ;;  %v637_v41 = vpop.f32.mrf.mxu1 }
 0x477   :  { %v735_v50 = vpop.f32.mrf.mxu0  ;;  %v748_v52 = vpop.f32.mrf.mxu1 }
 0x478   :  { %v736_v54 = vadd.f32 %v735_v50, %v163_v47  ;;  %v2881_v31 = vadd.f32 %v748_v52, %v192_v48 }
 0x47a   :  { %2410 = vtanh.f32 %v2881_v31  ;;  %v2230_v10 = vmul.f32 -1.442695, %v736_v54 }
 0x47c   :  { %v651_v55 = vpop.f32.mrf.mxu2  ;;  %v664_v56 = vpop.f32.mrf.mxu3 }
 0x47d   :  { %v652_v57 = vadd.f32 %v651_v55, %v622_v40  ;;  %v665_v59 = vadd.f32 %v664_v56, %v635_v45 }
 0x47f   :  { %v2885_v61 = vadd.f32 %v665_v59, %v2785_v29  ;;  %v737_v37 = vpop.f32.mrf.mxu0  ;;  %v750_v63 = vpop.f32.mrf.mxu1  ;;  %v668_v13 = vadd.f32 %v652_v57, %v2797_v58 }
 0x480   :  { %v2411_v1 = vpop.eup %2410 }
 0x481   :  { %2412 = vtanh.f32 %v2885_v61  ;;  %793 = vrot.lane.b32.xlu1 %v2411_v1, %s2600_s28  ;;  %v2226_v15 = vmul.f32 -1.442695, %v668_v13 }
 0x482   :  { %2414 = vpow2.f32 %v2230_v10 }
 0x483   :  { %2416 = vpow2.f32 %v2226_v15 }
 0x484   :  { %v653_v4 = vpop.f32.mrf.mxu2  ;;  %v666_v6 = vpop.f32.mrf.mxu3 }
 0x487   :  { %v2413_v9 = vpop.eup %2412 }
 0x488   :  { %711 = vrot.lane.b32.xlu0 %v2413_v9, %s2600_s28  ;;  %v2415_v40 = vpop.eup %2414 }
 0x489   :  { %v758_v45 = vadd.f32 1.0, %v2415_v40  ;;  %v2417_v46 = vpop.eup %2416 }
 0x48a   :  { %v676_v41 = vadd.f32 1.0, %v2417_v46 }
 0x48b   :  { %2418 = vrcp.f32 %v758_v45  ;;  %v771_v54 = vand.u32 2147483648, %v758_v45  ;;  %vm765_vm13 = vweird.f32 %v758_v45  ;;  %v769_v57 = vand.u32 2147483647, %v758_v45 }
 0x48c   :  { %2420 = vrcp.f32 %v676_v41  ;;  %v689_v15 = vand.u32 2147483648, %v676_v41  ;;  %vm683_vm2 = vweird.f32 %v676_v41  ;;  %v687_v40 = vand.u32 2147483647, %v676_v41 }
 0x48d   :  { %v772_v4 = vor.u32 1.1754944e-38, %v771_v54  ;;  %vm770_vm15 = vcmp.eq.f32.partialorder %v769_v57, 8.507059e+37 }
 0x48e   :  { %vm688_vm4 = vcmp.eq.f32.partialorder %v687_v40, 8.507059e+37 }
 0x491   :  { %v2419_v47 = vpop.eup %2418 }
 0x492   :  { %v761_v48 = vmul.f32 %v2419_v47, %v758_v45  ;;  %v2421_v50 = vpop.eup %2420  ;;  %vm766_vm12 = vweird.f32 %v2419_v47 }
 0x493   :  { %v679_v55 = vmul.f32 %v2421_v50, %v676_v41  ;;  %vm767_vm14 = vmor %vm765_vm13, %vm766_vm12  ;;  %vm684_vm1 = vweird.f32 %v2421_v50 }
 0x494   :  { %v762_v52 = vsub.f32 1.0, %v761_v48  ;;  %vm685_vm3 = vmor %vm683_vm2, %vm684_vm1  ;;  %v690_v48 = vor.u32 1.1754944e-38, %v689_v15 }
 0x495   :  { %v680_v59 = vsub.f32 1.0, %v679_v55 }
 0x496   :  { %v763_v56 = vmul.f32 %v2419_v47, %v762_v52 }
 0x497   :  { %v681_v63 = vmul.f32 %v2421_v50, %v680_v59 }
 0x498   :  { %v764_v37 = vadd.f32 %v2419_v47, %v763_v56 }
 0x499   :  { %v682_v10 = vadd.f32 %v2421_v50, %v681_v63  ;;  %v2227_v63 = vmul.f32 -1.442695, %v2885_v61 }
 0x49a   :  { %v768_v1 = vsel %vm767_vm14, %v2419_v47, %v764_v37 }
 0x49b   :  { %v773_v9 = vsel %vm770_vm15, %v772_v4, %v768_v1  ;;  %v686_v46 = vsel %vm685_vm3, %v2421_v50, %v682_v10 }
 0x49c   :  { %v691_v52 = vsel %vm688_vm4, %v690_v48, %v686_v46  ;;  %v791_v41 = vmul.f32 %v773_v9, %v2818_v11 }
 0x49d   :  { %v709_v47 = vmul.f32 %v691_v52, %v2808_v2  ;;  %v2231_v2 = vmul.f32 -1.442695, %v2881_v31 }
 0x4f3   :  { %v794_v6 = vpop.permute.xlu1 %793 }
 0x4f4   :  { %v796_v13 = vmul.f32 %v794_v6, %v773_v9 }
 0x4f6   :  { %798 = vrot.lane.b32.xlu0 %v796_v13, %s2600_s28 }
 0x4fa   :  { %v712_v45 = vpop.permute.xlu0 %711 }
 0x4fb   :  { %v714_v55 = vmul.f32 %v712_v45, %v691_v52 }
 0x4fd   :  { %716 = vrot.lane.b32.xlu2 %v714_v55, %s2600_s28 }
 0x557   :  { %v717_v56 = vpop.permute.xlu2 %716 }
 0x558   :  { %v2894_v59 = vadd.f32 %v717_v56, %v709_v47 }
 0x55a   :  { %2422 = vtanh.f32 %v2894_v59 }
 0x560   :  { %v2423_v37 = vpop.eup %2422 }
 0x561   :  { %722 = vrot.lane.b32.xlu1 %v2423_v37, %s2600_s28 }
 0x568   :  { %v799_v50 = vpop.permute.xlu0 %798 }
 0x569   :  { %v2899_v54 = vadd.f32 %v799_v50, %v791_v41 }
 0x56b   :  { %2424 = vtanh.f32 %v2899_v54 }
 0x56c   :  { %2426 = vpow2.f32 %v2231_v2 }
 0x56d   :  { %2428 = vpow2.f32 %v2227_v63 }
 0x571   :  { %v2425_v57 = vpop.eup %2424 }
 0x572   :  { %804 = vrot.lane.b32.xlu2 %v2425_v57, %s2600_s28  ;;  %v2427_v1 = vpop.eup %2426 }
 0x573   :  { %v759_v4 = vadd.f32 1.0, %v2427_v1  ;;  %v2429_v6 = vpop.eup %2428 }
 0x574   :  { %v677_v10 = vadd.f32 1.0, %v2429_v6 }
 0x575   :  { %2430 = vrcp.f32 %v759_v4  ;;  %v786_v31 = vand.u32 2147483648, %v759_v4  ;;  %vm780_vm6 = vweird.f32 %v759_v4  ;;  %v784_v52 = vand.u32 2147483647, %v759_v4 }
 0x576   :  { %2432 = vrcp.f32 %v677_v10  ;;  %v704_v57 = vand.u32 2147483648, %v677_v10  ;;  %vm698_vm11 = vweird.f32 %v677_v10  ;;  %v702_v2 = vand.u32 2147483647, %v677_v10 }
 0x577   :  { %v787_v47 = vor.u32 1.1754944e-38, %v786_v31  ;;  %vm785_vm8 = vcmp.eq.f32.partialorder %v784_v52, 8.507059e+37 }
 0x578   :  { %vm703_vm13 = vcmp.eq.f32.partialorder %v702_v2, 8.507059e+37 }
 0x57b   :  { %v2431_v11 = vpop.eup %2430 }
 0x57c   :  { %v776_v9 = vmul.f32 %v2431_v11, %v759_v4  ;;  %v2433_v13 = vpop.eup %2432  ;;  %vm781_vm5 = vweird.f32 %v2431_v11  ;;  %v705_v4 = vor.u32 1.1754944e-38, %v704_v57 }
 0x57d   :  { %v694_v40 = vmul.f32 %v2433_v13, %v677_v10  ;;  %vm782_vm7 = vmor %vm780_vm6, %vm781_vm5  ;;  %vm699_vm10 = vweird.f32 %v2433_v13 }
 0x57e   :  { %v777_v15 = vsub.f32 1.0, %v776_v9  ;;  %vm700_vm12 = vmor %vm698_vm11, %vm699_vm10 }
 0x57f   :  { %v695_v48 = vsub.f32 1.0, %v694_v40 }
 0x580   :  { %v778_v46 = vmul.f32 %v2431_v11, %v777_v15 }
 0x581   :  { %v696_v61 = vmul.f32 %v2433_v13, %v695_v48 }
 0x582   :  { %v779_v45 = vadd.f32 %v2431_v11, %v778_v46 }
 0x583   :  { %v697_v41 = vadd.f32 %v2433_v13, %v696_v61 }
 0x584   :  { %v783_v55 = vsel %vm782_vm7, %v2431_v11, %v779_v45 }
 0x585   :  { %v788_v56 = vsel %vm785_vm8, %v787_v47, %v783_v55  ;;  %v701_v1 = vsel %vm700_vm12, %v2433_v13, %v697_v41 }
 0x586   :  { %v706_v6 = vsel %vm703_vm13, %v705_v4, %v701_v1 }
 0x5cc   :  { %v805_v37 = vpop.permute.xlu2 %804 }
 0x5cd   :  { %v807_v50 = vmul.f32 %v805_v37, %v788_v56  ;;  %v194_v37 = vadd.f32 %v2861_v53, %v2668_v33 }
 0x5cf   :  { %v808_v63 = vpack.c.bf16 %v807_v50, %v807_v50 }
 0x5d1   :  { %2234 = vmatmul.msk.bf16.vlgmr.msrb.gmra.mxu0 %vm246_vm9, %v808_v63  ;;  %2235 = vmatmul.msk.bf16.vlgmr.msrb.gmra.mxu1 %vm246_vm9, %v808_v63 }
 0x5d2   :  { %1130 = vmatpush.bf16.msrb.mxu0 %v2642_v14  ;;  %1143 = vmatpush.bf16.msrb.mxu1 %v2634_v3 }
 0x5d3   :  { %v723_v11 = vpop.permute.xlu1 %722 }
 0x5d4   :  { %v725_v9 = vmul.f32 %v723_v11, %v706_v6  ;;  %v165_v11 = vadd.f32 %v2859_v17, %v2675_v42 }
 0x5d6   :  { %v809_v15 = vpack.c.bf16 %v725_v9, %v725_v9  ;;  %1131 = vmatpush.bf16.msrb.mxu0 %v2649_v23  ;;  %1144 = vmatpush.bf16.msrb.mxu1 %v2637_v8 }
 0x5d8   :  { %2232 = vmatmul.msk.bf16.vlgmr.msrb.gmra.mxu2 %vm246_vm9, %v809_v15  ;;  %2233 = vmatmul.msk.bf16.vlgmr.msrb.gmra.mxu3 %vm246_vm9, %v809_v15 }
 0x5d9   :  { %1059 = vmatpush.bf16.msrb.mxu3 %v2709_v35  ;;  %1046 = vmatpush.bf16.msrb.mxu2 %v2712_v36 }
 0x5da   :  { %1145 = vmatpush.bf16.msrb.mxu1 %v2645_v19  ;;  %1132 = vmatpush.bf16.msrb.mxu0 %v2655_v27 }
 0x5dd   :  { %1060 = vmatpush.bf16.msrb.mxu3 %v2718_v43  ;;  %1047 = vmatpush.bf16.msrb.mxu2 %v2721_v44 }
 0x5de   :  { %1133 = vmatpush.bf16.msrb.mxu0 %v2660_v30  ;;  %1146 = vmatpush.bf16.msrb.mxu1 %v2652_v26 }
 0x5e1   :  { %1061 = vmatpush.bf16.msrb.mxu3 %v2729_v49  ;;  %1048 = vmatpush.bf16.msrb.mxu2 %v2733_v51 }
 0x5e5   :  { %1062 = vmatpush.bf16.msrb.mxu3 %v2748_v60  ;;  %1049 = vmatpush.bf16.msrb.mxu2 %v2750_v62 }
 0x5e8   :  { %2238 = vmatmul.msk.bf16.vlgmr.msra.gmra.mxu2 %vm246_vm9, %v808_v63  ;;  %2239 = vmatmul.msk.bf16.vlgmr.msra.gmra.mxu3 %vm246_vm9, %v808_v63 }
 0x5e9   :  { %1230 = vmatpush.bf16.msra.mxu3 %v2682_v0  ;;  %1217 = vmatpush.bf16.msra.mxu2 %v2684_v5 }
 0x5ed   :  { %1231 = vmatpush.bf16.msra.mxu3 %v2687_v7  ;;  %1218 = vmatpush.bf16.msra.mxu2 %v2691_v12 }
 0x5f1   :  { %1232 = vmatpush.bf16.msra.mxu3 %v2695_v16  ;;  %1219 = vmatpush.bf16.msra.mxu2 %v2699_v20 }
 0x5f5   :  { %1233 = vmatpush.bf16.msra.mxu3 %v2703_v32  ;;  %1220 = vmatpush.bf16.msra.mxu2 %v2707_v34 }
 0x64e   :  { %v851_v10 = vpop.f32.mrf.mxu0  ;;  %v864_v13 = vpop.f32.mrf.mxu1 }
 0x656   :  { %v853_v40 = vpop.f32.mrf.mxu0  ;;  %v866_v46 = vpop.f32.mrf.mxu1 }
 0x65b   :  { %v822_v48 = vpop.f32.mrf.mxu2  ;;  %v835_v45 = vpop.f32.mrf.mxu3 }
 0x65c   :  { %v852_v31 = vadd.f32 %v851_v10, %v822_v48  ;;  %v865_v52 = vadd.f32 %v864_v13, %v835_v45 }
 0x65e   :  { %v2936_v61 = vadd.f32 %v865_v52, %v2785_v29  ;;  %v868_v4 = vadd.f32 %v852_v31, %v2797_v58 }
 0x660   :  { %2434 = vtanh.f32 %v2936_v61  ;;  %v2236_v6 = vmul.f32 -1.442695, %v868_v4 }
 0x663   :  { %v824_v55 = vpop.f32.mrf.mxu2  ;;  %v837_v47 = vpop.f32.mrf.mxu3 }
 0x666   :  { %v2435_v56 = vpop.eup %2434 }
 0x667   :  { %911 = vrot.lane.b32.xlu1 %v2435_v56, %s2600_s28 }
 0x66b   :  { %v935_v41 = vpop.f32.mrf.mxu2  ;;  %v948_v50 = vpop.f32.mrf.mxu3 }
 0x66c   :  { %v2942_v57 = vadd.f32 %v948_v50, %v194_v37  ;;  %v936_v53 = vadd.f32 %v935_v41, %v165_v11 }
 0x66e   :  { %2436 = vtanh.f32 %v2942_v57  ;;  %v2240_v10 = vmul.f32 -1.442695, %v936_v53 }
 0x66f   :  { %2438 = vpow2.f32 %v2236_v6 }
 0x673   :  { %v937_v2 = vpop.f32.mrf.mxu2  ;;  %v950_v63 = vpop.f32.mrf.mxu3 }
 0x674   :  { %v2437_v1 = vpop.eup %2436 }
 0x675   :  { %993 = vrot.lane.b32.xlu0 %v2437_v1, %s2600_s28  ;;  %v2439_v9 = vpop.eup %2438 }
 0x676   :  { %v876_v15 = vadd.f32 1.0, %v2439_v9 }
 0x678   :  { %2440 = vrcp.f32 %v876_v15  ;;  %v889_v47 = vand.u32 2147483648, %v876_v15  ;;  %vm883_vm15 = vweird.f32 %v876_v15  ;;  %v887_v56 = vand.u32 2147483647, %v876_v15 }
 0x679   :  { %2442 = vpow2.f32 %v2240_v10 }
 0x67a   :  { %v890_v41 = vor.u32 1.1754944e-38, %v889_v47  ;;  %vm888_vm2 = vcmp.eq.f32.partialorder %v887_v56, 8.507059e+37 }
 0x67e   :  { %v2441_v13 = vpop.eup %2440 }
 0x67f   :  { %v2443_v40 = vpop.eup %2442  ;;  %v879_v46 = vmul.f32 %v2441_v13, %v876_v15  ;;  %vm884_vm14 = vweird.f32 %v2441_v13 }
 0x680   :  { %v958_v48 = vadd.f32 1.0, %v2443_v40  ;;  %vm885_vm1 = vmor %vm883_vm15, %vm884_vm14 }
 0x681   :  { %v880_v45 = vsub.f32 1.0, %v879_v46 }
 0x682   :  { %2444 = vrcp.f32 %v958_v48  ;;  %v971_v11 = vand.u32 2147483648, %v958_v48  ;;  %vm965_vm4 = vweird.f32 %v958_v48  ;;  %v969_v9 = vand.u32 2147483647, %v958_v48 }
 0x683   :  { %v881_v52 = vmul.f32 %v2441_v13, %v880_v45 }
 0x684   :  { %v972_v15 = vor.u32 1.1754944e-38, %v971_v11  ;;  %vm970_vm6 = vcmp.eq.f32.partialorder %v969_v9, 8.507059e+37 }
 0x685   :  { %v882_v31 = vadd.f32 %v2441_v13, %v881_v52 }
 0x687   :  { %v886_v37 = vsel %vm885_vm1, %v2441_v13, %v882_v31 }
 0x688   :  { %v2445_v55 = vpop.eup %2444  ;;  %v891_v63 = vsel %vm888_vm2, %v890_v41, %v886_v37  ;;  %v2241_v41 = vmul.f32 -1.442695, %v2942_v57 }
 0x689   :  { %v961_v17 = vmul.f32 %v2445_v55, %v958_v48  ;;  %vm966_vm3 = vweird.f32 %v2445_v55  ;;  %v909_v47 = vmul.f32 %v891_v63, %v2894_v59 }
 0x68a   :  { %vm967_vm5 = vmor %vm965_vm4, %vm966_vm3 }
 0x68b   :  { %v962_v50 = vsub.f32 1.0, %v961_v17 }
 0x68d   :  { %v963_v4 = vmul.f32 %v2445_v55, %v962_v50 }
 0x68f   :  { %v964_v6 = vadd.f32 %v2445_v55, %v963_v4 }
 0x691   :  { %v968_v53 = vsel %vm967_vm5, %v2445_v55, %v964_v6 }
 0x692   :  { %v973_v13 = vsel %vm970_vm6, %v972_v15, %v968_v53 }
 0x693   :  { %v991_v46 = vmul.f32 %v973_v13, %v2899_v54  ;;  %v2237_v54 = vmul.f32 -1.442695, %v2936_v61 }
 0x6d9   :  { %v912_v2 = vpop.permute.xlu1 %911 }
 0x6da   :  { %v914_v1 = vmul.f32 %v912_v2, %v891_v63 }
 0x6dc   :  { %916 = vrot.lane.b32.xlu0 %v914_v1, %s2600_s28 }
 0x6e7   :  { %v994_v10 = vpop.permute.xlu0 %993 }
 0x6e8   :  { %v996_v40 = vmul.f32 %v994_v10, %v973_v13 }
 0x6ea   :  { %998 = vrot.lane.b32.xlu2 %v996_v40, %s2600_s28 }
 0x744   :  { %v999_v45 = vpop.permute.xlu2 %998 }
 0x745   :  { %v2952_v52 = vadd.f32 %v999_v45, %v991_v46 }
 0x747   :  { %2446 = vtanh.f32 %v2952_v52 }
 0x74d   :  { %v2447_v31 = vpop.eup %2446 }
 0x74e   :  { %1004 = vrot.lane.b32.xlu1 %v2447_v31, %s2600_s28  ;;  %v917_v48 = vpop.permute.xlu0 %916 }
 0x74f   :  { %v2957_v55 = vadd.f32 %v917_v48, %v909_v47 }
 0x751   :  { %2448 = vtanh.f32 %v2957_v55 }
 0x752   :  { %2450 = vpow2.f32 %v2237_v54 }
 0x757   :  { %v2449_v56 = vpop.eup %2448 }
 0x758   :  { %922 = vrot.lane.b32.xlu2 %v2449_v56, %s2600_s28  ;;  %v2451_v17 = vpop.eup %2450 }
 0x759   :  { %v877_v37 = vadd.f32 1.0, %v2451_v17 }
 0x75b   :  { %2452 = vrcp.f32 %v877_v37  ;;  %v904_v9 = vand.u32 2147483648, %v877_v37  ;;  %vm898_vm8 = vweird.f32 %v877_v37  ;;  %v902_v61 = vand.u32 2147483647, %v877_v37 }
 0x75c   :  { %2454 = vpow2.f32 %v2241_v41 }
 0x75d   :  { %v905_v10 = vor.u32 1.1754944e-38, %v904_v9  ;;  %vm903_vm11 = vcmp.eq.f32.partialorder %v902_v61, 8.507059e+37 }
 0x761   :  { %v2453_v59 = vpop.eup %2452 }
 0x762   :  { %v2455_v50 = vpop.eup %2454  ;;  %v894_v2 = vmul.f32 %v2453_v59, %v877_v37  ;;  %vm899_vm7 = vweird.f32 %v2453_v59 }
 0x763   :  { %v959_v63 = vadd.f32 1.0, %v2455_v50  ;;  %vm900_vm10 = vmor %vm898_vm8, %vm899_vm7 }
 0x764   :  { %v895_v1 = vsub.f32 1.0, %v894_v2 }
 0x765   :  { %2456 = vrcp.f32 %v959_v63  ;;  %v986_v48 = vand.u32 2147483648, %v959_v63  ;;  %vm980_vm13 = vweird.f32 %v959_v63  ;;  %v984_v56 = vand.u32 2147483647, %v959_v63 }
 0x766   :  { %v896_v4 = vmul.f32 %v2453_v59, %v895_v1 }
 0x767   :  { %v987_v17 = vor.u32 1.1754944e-38, %v986_v48  ;;  %vm985_vm15 = vcmp.eq.f32.partialorder %v984_v56, 8.507059e+37 }
 0x768   :  { %v897_v11 = vadd.f32 %v2453_v59, %v896_v4 }
 0x76a   :  { %v901_v15 = vsel %vm900_vm10, %v2453_v59, %v897_v11  ;;  %v197_v11 = vadd.f32 %v2865_v21, %v2668_v33 }
 0x76b   :  { %v2457_v6 = vpop.eup %2456  ;;  %v906_v13 = vsel %vm903_vm11, %v905_v10, %v901_v15 }
 0x76c   :  { %v976_v53 = vmul.f32 %v2457_v6, %v959_v63  ;;  %vm981_vm12 = vweird.f32 %v2457_v6 }
 0x76d   :  { %vm982_vm14 = vmor %vm980_vm13, %vm981_vm12 }
 0x76e   :  { %v977_v57 = vsub.f32 1.0, %v976_v53 }
 0x770   :  { %v978_v31 = vmul.f32 %v2457_v6, %v977_v57 }
 0x772   :  { %v979_v47 = vadd.f32 %v2457_v6, %v978_v31 }
 0x774   :  { %v983_v54 = vsel %vm982_vm14, %v2457_v6, %v979_v47  ;;  %v168_v6 = vadd.f32 %v2863_v18, %v2675_v42 }
 0x775   :  { %v988_v37 = vsel %vm985_vm15, %v987_v17, %v983_v54 }
 0x7b2   :  { %v923_v40 = vpop.permute.xlu2 %922 }
 0x7b3   :  { %v925_v46 = vmul.f32 %v923_v40, %v906_v13 }
 0x7b5   :  { %v1009_v45 = vpack.c.bf16 %v925_v46, %v925_v46 }
 0x7b7   :  { %2242 = vmatmul.msk.bf16.vlgmr.msra.gmra.mxu0 %vm246_vm9, %v1009_v45  ;;  %2243 = vmatmul.msk.bf16.vlgmr.msra.gmra.mxu1 %vm246_vm9, %v1009_v45 }
 0x7b8   :  { %1246 = vmatpush.bf16.msra.mxu0 %v2712_v36  ;;  %1259 = vmatpush.bf16.msra.mxu1 %v2709_v35 }
 0x7bc   :  { %1247 = vmatpush.bf16.msra.mxu0 %v2721_v44  ;;  %1260 = vmatpush.bf16.msra.mxu1 %v2718_v43 }
 0x7c0   :  { %v1005_v41 = vpop.permute.xlu1 %1004  ;;  %1248 = vmatpush.bf16.msra.mxu0 %v2733_v51  ;;  %1261 = vmatpush.bf16.msra.mxu1 %v2729_v49 }
 0x7c1   :  { %v1007_v59 = vmul.f32 %v1005_v41, %v988_v37 }
 0x7c3   :  { %v1008_v50 = vpack.c.bf16 %v1007_v59, %v1007_v59 }
 0x7c4   :  { %1249 = vmatpush.bf16.msra.mxu0 %v2750_v62  ;;  %1262 = vmatpush.bf16.msra.mxu1 %v2748_v60 }
 0x7c5   :  { %2244 = vmatmul.msk.bf16.vlgmr.msrb.gmra.mxu2 %vm246_vm9, %v1008_v50  ;;  %2245 = vmatmul.msk.bf16.vlgmr.msrb.gmra.mxu3 %vm246_vm9, %v1008_v50 }
 0x7c6   :  { %1343 = vmatpush.bf16.msrb.mxu3 %v2634_v3  ;;  %1330 = vmatpush.bf16.msrb.mxu2 %v2642_v14 }
 0x7c7   :  { %2248 = vmatmul.msk.bf16.vlgmr.msrb.gmra.mxu0 %vm246_vm9, %v1008_v50  ;;  %2249 = vmatmul.msk.bf16.vlgmr.msrb.gmra.mxu1 %vm246_vm9, %v1008_v50 }
 0x7c8   :  { %1417 = vmatpush.bf16.msrb.mxu0 %v2684_v5  ;;  %1430 = vmatpush.bf16.msrb.mxu1 %v2682_v0 }
 0x7ca   :  { %1344 = vmatpush.bf16.msrb.mxu3 %v2637_v8  ;;  %1331 = vmatpush.bf16.msrb.mxu2 %v2649_v23 }
 0x7cc   :  { %1418 = vmatpush.bf16.msrb.mxu0 %v2691_v12  ;;  %1431 = vmatpush.bf16.msrb.mxu1 %v2687_v7 }
 0x7ce   :  { %1345 = vmatpush.bf16.msrb.mxu3 %v2645_v19  ;;  %1332 = vmatpush.bf16.msrb.mxu2 %v2655_v27 }
 0x7d0   :  { %1419 = vmatpush.bf16.msrb.mxu0 %v2699_v20  ;;  %1432 = vmatpush.bf16.msrb.mxu1 %v2695_v16 }
 0x7d2   :  { %1346 = vmatpush.bf16.msrb.mxu3 %v2652_v26  ;;  %1333 = vmatpush.bf16.msrb.mxu2 %v2660_v30 }
 0x7d4   :  { %1420 = vmatpush.bf16.msrb.mxu0 %v2707_v34  ;;  %1433 = vmatpush.bf16.msrb.mxu1 %v2703_v32 }
 0x834   :  { %v1022_v2 = vpop.f32.mrf.mxu0  ;;  %v1035_v63 = vpop.f32.mrf.mxu1 }
 0x83c   :  { %v1024_v1 = vpop.f32.mrf.mxu0  ;;  %v1037_v4 = vpop.f32.mrf.mxu1 }
 0x844   :  { %v1135_v9 = vpop.f32.mrf.mxu0  ;;  %v1148_v61 = vpop.f32.mrf.mxu1 }
 0x845   :  { %v1136_v53 = vadd.f32 %v1135_v9, %v168_v6  ;;  %v2997_v15 = vadd.f32 %v1148_v61, %v197_v11 }
 0x847   :  { %2458 = vtanh.f32 %v2997_v15  ;;  %v2250_v56 = vmul.f32 -1.442695, %v1136_v53 }
 0x848   :  { %v1051_v10 = vpop.f32.mrf.mxu2  ;;  %v1064_v57 = vpop.f32.mrf.mxu3 }
 0x849   :  { %v1052_v13 = vadd.f32 %v1051_v10, %v1022_v2  ;;  %v1065_v40 = vadd.f32 %v1064_v57, %v1035_v63 }
 0x84b   :  { %v3001_v46 = vadd.f32 %v1065_v40, %v2785_v29  ;;  %v1068_v54 = vadd.f32 %v1052_v13, %v2797_v58 }
 0x84c   :  { %v1137_v45 = vpop.f32.mrf.mxu0  ;;  %v1150_v31 = vpop.f32.mrf.mxu1 }
 0x84d   :  { %v2459_v18 = vpop.eup %2458  ;;  %2460 = vtanh.f32 %v3001_v46  ;;  %v2246_v17 = vmul.f32 -1.442695, %v1068_v54 }
 0x84e   :  { %1193 = vrot.lane.b32.xlu1 %v2459_v18, %s2600_s28  ;;  %2462 = vpow2.f32 %v2250_v56 }
 0x84f   :  { %2464 = vpow2.f32 %v2246_v17 }
 0x850   :  { %v1053_v21 = vpop.f32.mrf.mxu2  ;;  %v1066_v47 = vpop.f32.mrf.mxu3 }
 0x853   :  { %v2461_v48 = vpop.eup %2460 }
 0x854   :  { %1111 = vrot.lane.b32.xlu0 %v2461_v48, %s2600_s28  ;;  %v2463_v37 = vpop.eup %2462 }
 0x855   :  { %v1158_v41 = vadd.f32 1.0, %v2463_v37  ;;  %v2465_v59 = vpop.eup %2464 }
 0x856   :  { %v1076_v50 = vadd.f32 1.0, %v2465_v59 }
 0x857   :  { %2466 = vrcp.f32 %v1158_v41  ;;  %v1171_v53 = vand.u32 2147483648, %v1158_v41  ;;  %vm1165_vm2 = vweird.f32 %v1158_v41  ;;  %v1169_v10 = vand.u32 2147483647, %v1158_v41 }
 0x858   :  { %2468 = vrcp.f32 %v1076_v50  ;;  %v1089_v21 = vand.u32 2147483648, %v1076_v50  ;;  %vm1083_vm6 = vweird.f32 %v1076_v50  ;;  %v1087_v48 = vand.u32 2147483647, %v1076_v50 }
 0x859   :  { %v1172_v40 = vor.u32 1.1754944e-38, %v1171_v53  ;;  %vm1170_vm4 = vcmp.eq.f32.partialorder %v1169_v10, 8.507059e+37 }
 0x85a   :  { %v1090_v54 = vor.u32 1.1754944e-38, %v1089_v21  ;;  %vm1088_vm8 = vcmp.eq.f32.partialorder %v1087_v48, 8.507059e+37 }
 0x85d   :  { %v2467_v2 = vpop.eup %2466 }
 0x85e   :  { %v1161_v63 = vmul.f32 %v2467_v2, %v1158_v41  ;;  %v2469_v1 = vpop.eup %2468  ;;  %vm1166_vm1 = vweird.f32 %v2467_v2 }
 0x85f   :  { %v1079_v6 = vmul.f32 %v2469_v1, %v1076_v50  ;;  %vm1167_vm3 = vmor %vm1165_vm2, %vm1166_vm1  ;;  %vm1084_vm5 = vweird.f32 %v2469_v1 }
 0x860   :  { %v1162_v4 = vsub.f32 1.0, %v1161_v63  ;;  %vm1085_vm7 = vmor %vm1083_vm6, %vm1084_vm5 }
 0x861   :  { %v1080_v9 = vsub.f32 1.0, %v1079_v6 }
 0x862   :  { %v1163_v11 = vmul.f32 %v2467_v2, %v1162_v4 }
 0x863   :  { %v1081_v57 = vmul.f32 %v2469_v1, %v1080_v9  ;;  %v2247_v9 = vmul.f32 -1.442695, %v3001_v46 }
 0x864   :  { %v1164_v61 = vadd.f32 %v2467_v2, %v1163_v11 }
 0x865   :  { %v1082_v45 = vadd.f32 %v2469_v1, %v1081_v57 }
 0x866   :  { %v1168_v13 = vsel %vm1167_vm3, %v2467_v2, %v1164_v61 }
 0x867   :  { %v1173_v18 = vsel %vm1170_vm4, %v1172_v40, %v1168_v13  ;;  %v1086_v56 = vsel %vm1085_vm7, %v2469_v1, %v1082_v45 }
 0x868   :  { %v1091_v37 = vsel %vm1088_vm8, %v1090_v54, %v1086_v56  ;;  %v1191_v50 = vmul.f32 %v1173_v18, %v2952_v52 }
 0x869   :  { %v1109_v59 = vmul.f32 %v1091_v37, %v2957_v55  ;;  %v2251_v55 = vmul.f32 -1.442695, %v2997_v15 }
 0x8c0   :  { %v1194_v31 = vpop.permute.xlu1 %1193 }
 0x8c1   :  { %v1196_v47 = vmul.f32 %v1194_v31, %v1173_v18 }
 0x8c3   :  { %1198 = vrot.lane.b32.xlu0 %v1196_v47, %s2600_s28 }
 0x8c6   :  { %v1112_v17 = vpop.permute.xlu0 %1111 }
 0x8c7   :  { %v1114_v41 = vmul.f32 %v1112_v17, %v1091_v37 }
 0x8c9   :  { %1116 = vrot.lane.b32.xlu2 %v1114_v41, %s2600_s28 }
 0x923   :  { %v1117_v2 = vpop.permute.xlu2 %1116 }
 0x924   :  { %v3010_v63 = vadd.f32 %v1117_v2, %v1109_v59 }
 0x926   :  { %2470 = vtanh.f32 %v3010_v63 }
 0x92c   :  { %v2471_v4 = vpop.eup %2470 }
 0x92d   :  { %1122 = vrot.lane.b32.xlu1 %v2471_v4, %s2600_s28 }
 0x935   :  { %v1199_v1 = vpop.permute.xlu0 %1198 }
 0x936   :  { %v3015_v6 = vadd.f32 %v1199_v1, %v1191_v50 }
 0x938   :  { %2472 = vtanh.f32 %v3015_v6 }
 0x939   :  { %2474 = vpow2.f32 %v2251_v55 }
 0x93a   :  { %2476 = vpow2.f32 %v2247_v9 }
 0x93e   :  { %v2473_v11 = vpop.eup %2472 }
 0x93f   :  { %1204 = vrot.lane.b32.xlu2 %v2473_v11, %s2600_s28  ;;  %v2475_v61 = vpop.eup %2474 }
 0x940   :  { %v1159_v53 = vadd.f32 1.0, %v2475_v61  ;;  %v2477_v10 = vpop.eup %2476 }
 0x941   :  { %v1077_v57 = vadd.f32 1.0, %v2477_v10 }
 0x942   :  { %2478 = vrcp.f32 %v1159_v53  ;;  %v1186_v15 = vand.u32 2147483648, %v1159_v53  ;;  %vm1180_vm11 = vweird.f32 %v1159_v53  ;;  %v1184_v48 = vand.u32 2147483647, %v1159_v53 }
 0x943   :  { %2480 = vrcp.f32 %v1077_v57  ;;  %v1104_v59 = vand.u32 2147483648, %v1077_v57  ;;  %vm1098_vm15 = vweird.f32 %v1077_v57  ;;  %v1102_v4 = vand.u32 2147483647, %v1077_v57 }
 0x944   :  { %v1187_v54 = vor.u32 1.1754944e-38, %v1186_v15  ;;  %vm1185_vm13 = vcmp.eq.f32.partialorder %v1184_v48, 8.507059e+37 }
 0x945   :  { %v1105_v11 = vor.u32 1.1754944e-38, %v1104_v59  ;;  %vm1103_vm2 = vcmp.eq.f32.partialorder %v1102_v4, 8.507059e+37 }
 0x948   :  { %v2479_v52 = vpop.eup %2478 }
 0x949   :  { %v1176_v13 = vmul.f32 %v2479_v52, %v1159_v53  ;;  %v2481_v40 = vpop.eup %2480  ;;  %vm1181_vm10 = vweird.f32 %v2479_v52 }
 0x94a   :  { %v1094_v31 = vmul.f32 %v2481_v40, %v1077_v57  ;;  %vm1182_vm12 = vmor %vm1180_vm11, %vm1181_vm10  ;;  %vm1099_vm14 = vweird.f32 %v2481_v40 }
 0x94b   :  { %v1177_v45 = vsub.f32 1.0, %v1176_v13  ;;  %vm1100_vm1 = vmor %vm1098_vm15, %vm1099_vm14 }
 0x94c   :  { %v1095_v21 = vsub.f32 1.0, %v1094_v31 }
 0x94d   :  { %v1178_v18 = vmul.f32 %v2479_v52, %v1177_v45 }
 0x94e   :  { %v1096_v46 = vmul.f32 %v2481_v40, %v1095_v21 }
 0x94f   :  { %v1179_v47 = vadd.f32 %v2479_v52, %v1178_v18 }
 0x950   :  { %v1097_v17 = vadd.f32 %v2481_v40, %v1096_v46  ;;  %v199_v46 = vadd.f32 %v2869_v24, %v2668_v33 }
 0x951   :  { %v1183_v56 = vsel %vm1182_vm12, %v2479_v52, %v1179_v47 }
 0x952   :  { %v1188_v37 = vsel %vm1185_vm13, %v1187_v54, %v1183_v56  ;;  %v1101_v1 = vsel %vm1100_vm1, %v2481_v40, %v1097_v17 }
 0x953   :  { %v1106_v55 = vsel %vm1103_vm2, %v1105_v11, %v1101_v1 }
 0x999   :  { %v1205_v41 = vpop.permute.xlu2 %1204 }
 0x99a   :  { %v1207_v2 = vmul.f32 %v1205_v41, %v1188_v37 }
 0x99c   :  { %v1208_v50 = vpack.c.bf16 %v1207_v2, %v1207_v2 }
 0x99e   :  { %2254 = vmatmul.msk.bf16.vlgmr.msra.gmra.mxu0 %vm246_vm9, %v1208_v50  ;;  %2255 = vmatmul.msk.bf16.vlgmr.msra.gmra.mxu1 %vm246_vm9, %v1208_v50 }
 0x99f   :  { %v1123_v9 = vpop.permute.xlu1 %1122  ;;  %1530 = vmatpush.bf16.msra.mxu0 %v2642_v14  ;;  %1543 = vmatpush.bf16.msra.mxu1 %v2634_v3 }
 0x9a0   :  { %v1125_v61 = vmul.f32 %v1123_v9, %v1106_v55 }
 0x9a2   :  { %v1209_v53 = vpack.c.bf16 %v1125_v61, %v1125_v61 }
 0x9a3   :  { %1531 = vmatpush.bf16.msra.mxu0 %v2649_v23  ;;  %1544 = vmatpush.bf16.msra.mxu1 %v2637_v8 }
 0x9a4   :  { %2252 = vmatmul.msk.bf16.vlgmr.msra.gmra.mxu2 %vm246_vm9, %v1209_v53  ;;  %2253 = vmatmul.msk.bf16.vlgmr.msra.gmra.mxu3 %vm246_vm9, %v1209_v53 }
 0x9a5   :  { %1459 = vmatpush.bf16.msra.mxu3 %v2709_v35  ;;  %1446 = vmatpush.bf16.msra.mxu2 %v2712_v36 }
 0x9a7   :  { %1545 = vmatpush.bf16.msra.mxu1 %v2645_v19  ;;  %1532 = vmatpush.bf16.msra.mxu0 %v2655_v27 }
 0x9a9   :  { %1460 = vmatpush.bf16.msra.mxu3 %v2718_v43  ;;  %1447 = vmatpush.bf16.msra.mxu2 %v2721_v44 }
 0x9ab   :  { %1533 = vmatpush.bf16.msra.mxu0 %v2660_v30  ;;  %1546 = vmatpush.bf16.msra.mxu1 %v2652_v26 }
 0x9ad   :  { %1461 = vmatpush.bf16.msra.mxu3 %v2729_v49  ;;  %1448 = vmatpush.bf16.msra.mxu2 %v2733_v51 }
 0x9b1   :  { %1462 = vmatpush.bf16.msra.mxu3 %v2748_v60  ;;  %1449 = vmatpush.bf16.msra.mxu2 %v2750_v62 }
 0x9b4   :  { %2258 = vmatmul.msk.bf16.vlgmr.msrb.gmra.mxu2 %vm246_vm9, %v1208_v50  ;;  %2259 = vmatmul.msk.bf16.vlgmr.msrb.gmra.mxu3 %vm246_vm9, %v1208_v50  ;;  %v170_v50 = vadd.f32 %v2867_v22, %v2675_v42 }
 0x9b5   :  { %1630 = vmatpush.bf16.msrb.mxu3 %v2682_v0  ;;  %1617 = vmatpush.bf16.msrb.mxu2 %v2684_v5 }
 0x9b9   :  { %1631 = vmatpush.bf16.msrb.mxu3 %v2687_v7  ;;  %1618 = vmatpush.bf16.msrb.mxu2 %v2691_v12 }
 0x9bd   :  { %1632 = vmatpush.bf16.msrb.mxu3 %v2695_v16  ;;  %1619 = vmatpush.bf16.msrb.mxu2 %v2699_v20 }
 0x9c1   :  { %1633 = vmatpush.bf16.msrb.mxu3 %v2703_v32  ;;  %1620 = vmatpush.bf16.msrb.mxu2 %v2707_v34 }
 0xa1b   :  { %v1251_v10 = vpop.f32.mrf.mxu0  ;;  %v1264_v57 = vpop.f32.mrf.mxu1 }
 0xa23   :  { %v1253_v52 = vpop.f32.mrf.mxu0  ;;  %v1266_v13 = vpop.f32.mrf.mxu1 }
 0xa27   :  { %v1222_v40 = vpop.f32.mrf.mxu2  ;;  %v1235_v45 = vpop.f32.mrf.mxu3 }
 0xa28   :  { %v1252_v31 = vadd.f32 %v1251_v10, %v1222_v40  ;;  %v1265_v18 = vadd.f32 %v1264_v57, %v1235_v45 }
 0xa2a   :  { %v3052_v21 = vadd.f32 %v1265_v18, %v2785_v29  ;;  %v1268_v2 = vadd.f32 %v1252_v31, %v2797_v58 }
 0xa2c   :  { %2482 = vtanh.f32 %v3052_v21  ;;  %v2256_v4 = vmul.f32 -1.442695, %v1268_v2 }
 0xa2f   :  { %v1224_v47 = vpop.f32.mrf.mxu2  ;;  %v1237_v15 = vpop.f32.mrf.mxu3 }
 0xa32   :  { %v2483_v48 = vpop.eup %2482 }
 0xa33   :  { %1311 = vrot.lane.b32.xlu1 %v2483_v48, %s2600_s28 }
 0xa37   :  { %v1335_v56 = vpop.f32.mrf.mxu2  ;;  %v1348_v54 = vpop.f32.mrf.mxu3 }
 0xa38   :  { %v3058_v17 = vadd.f32 %v1348_v54, %v199_v46  ;;  %v1336_v24 = vadd.f32 %v1335_v56, %v170_v50 }
 0xa3a   :  { %2484 = vtanh.f32 %v3058_v17  ;;  %v2260_v55 = vmul.f32 -1.442695, %v1336_v24 }
 0xa3b   :  { %2486 = vpow2.f32 %v2256_v4 }
 0xa3f   :  { %v1337_v37 = vpop.f32.mrf.mxu2  ;;  %v1350_v41 = vpop.f32.mrf.mxu3 }
 0xa40   :  { %v2485_v59 = vpop.eup %2484 }
 0xa41   :  { %1393 = vrot.lane.b32.xlu0 %v2485_v59, %s2600_s28  ;;  %v2487_v1 = vpop.eup %2486 }
 0xa42   :  { %v1276_v11 = vadd.f32 1.0, %v2487_v1 }
 0xa44   :  { %2488 = vrcp.f32 %v1276_v11  ;;  %v1289_v45 = vand.u32 2147483648, %v1276_v11  ;;  %vm1283_vm4 = vweird.f32 %v1276_v11  ;;  %v1287_v31 = vand.u32 2147483647, %v1276_v11 }
 0xa45   :  { %2490 = vpow2.f32 %v2260_v55 }
 0xa46   :  { %v1290_v47 = vor.u32 1.1754944e-38, %v1289_v45  ;;  %vm1288_vm6 = vcmp.eq.f32.partialorder %v1287_v31, 8.507059e+37  ;;  %v2261_v45 = vmul.f32 -1.442695, %v3058_v17 }
 0xa4a   :  { %v2489_v9 = vpop.eup %2488 }
 0xa4b   :  { %v2491_v61 = vpop.eup %2490  ;;  %v1279_v53 = vmul.f32 %v2489_v9, %v1276_v11  ;;  %vm1284_vm3 = vweird.f32 %v2489_v9 }
 0xa4c   :  { %v1358_v10 = vadd.f32 1.0, %v2491_v61  ;;  %vm1285_vm5 = vmor %vm1283_vm4, %vm1284_vm3 }
 0xa4d   :  { %v1280_v57 = vsub.f32 1.0, %v1279_v53 }
 0xa4e   :  { %2492 = vrcp.f32 %v1358_v10  ;;  %v1371_v41 = vand.u32 2147483648, %v1358_v10  ;;  %vm1365_vm8 = vweird.f32 %v1358_v10  ;;  %v1369_v59 = vand.u32 2147483647, %v1358_v10 }
 0xa4f   :  { %v1281_v52 = vmul.f32 %v2489_v9, %v1280_v57 }
 0xa50   :  { %v1372_v4 = vor.u32 1.1754944e-38, %v1371_v41  ;;  %vm1370_vm11 = vcmp.eq.f32.partialorder %v1369_v59, 8.507059e+37 }
 0xa51   :  { %v1282_v40 = vadd.f32 %v2489_v9, %v1281_v52 }
 0xa53   :  { %v1286_v18 = vsel %vm1285_vm5, %v2489_v9, %v1282_v40 }
 0xa54   :  { %v2493_v13 = vpop.eup %2492  ;;  %v1291_v46 = vsel %vm1288_vm6, %v1290_v47, %v1286_v18 }
 0xa55   :  { %v1361_v22 = vmul.f32 %v2493_v13, %v1358_v10  ;;  %vm1366_vm7 = vweird.f32 %v2493_v13  ;;  %v1309_v53 = vmul.f32 %v1291_v46, %v3010_v63 }
 0xa56   :  { %vm1367_vm10 = vmor %vm1365_vm8, %vm1366_vm7 }
 0xa57   :  { %v1362_v15 = vsub.f32 1.0, %v1361_v22 }
 0xa59   :  { %v1363_v54 = vmul.f32 %v2493_v13, %v1362_v15 }
 0xa5b   :  { %v1364_v37 = vadd.f32 %v2493_v13, %v1363_v54 }
 0xa5d   :  { %v1368_v2 = vsel %vm1367_vm10, %v2493_v13, %v1364_v37 }
 0xa5e   :  { %v1373_v1 = vsel %vm1370_vm11, %v1372_v4, %v1368_v2 }
 0xa5f   :  { %v1391_v11 = vmul.f32 %v1373_v1, %v3015_v6  ;;  %v2257_v6 = vmul.f32 -1.442695, %v3052_v21 }
 0xaa5   :  { %v1312_v48 = vpop.permute.xlu1 %1311 }
 0xaa6   :  { %v1314_v56 = vmul.f32 %v1312_v48, %v1291_v46 }
 0xaa8   :  { %1316 = vrot.lane.b32.xlu0 %v1314_v56, %s2600_s28 }
 0xab3   :  { %v1394_v50 = vpop.permute.xlu0 %1393 }
 0xab4   :  { %v1396_v24 = vmul.f32 %v1394_v50, %v1373_v1 }
 0xab6   :  { %1398 = vrot.lane.b32.xlu2 %v1396_v24, %s2600_s28 }
 0xb10   :  { %v1399_v55 = vpop.permute.xlu2 %1398 }
 0xb11   :  { %v3068_v9 = vadd.f32 %v1399_v55, %v1391_v11 }
 0xb13   :  { %2494 = vtanh.f32 %v3068_v9 }
 0xb19   :  { %v2495_v61 = vpop.eup %2494 }
 0xb1a   :  { %1404 = vrot.lane.b32.xlu1 %v2495_v61, %s2600_s28  ;;  %v1317_v10 = vpop.permute.xlu0 %1316 }
 0xb1b   :  { %v3073_v57 = vadd.f32 %v1317_v10, %v1309_v53 }
 0xb1d   :  { %2496 = vtanh.f32 %v3073_v57 }
 0xb1e   :  { %2498 = vpow2.f32 %v2257_v6 }
 0xb23   :  { %v2497_v52 = vpop.eup %2496 }
 0xb24   :  { %1322 = vrot.lane.b32.xlu2 %v2497_v52, %s2600_s28  ;;  %v2499_v13 = vpop.eup %2498 }
 0xb25   :  { %v1277_v40 = vadd.f32 1.0, %v2499_v13 }
 0xb27   :  { %2500 = vrcp.f32 %v1277_v40  ;;  %v1304_v56 = vand.u32 2147483648, %v1277_v40  ;;  %vm1298_vm13 = vweird.f32 %v1277_v40  ;;  %v1302_v21 = vand.u32 2147483647, %v1277_v40 }
 0xb28   :  { %2502 = vpow2.f32 %v2261_v45 }
 0xb29   :  { %v1305_v41 = vor.u32 1.1754944e-38, %v1304_v56  ;;  %vm1303_vm15 = vcmp.eq.f32.partialorder %v1302_v21, 8.507059e+37 }
 0xb2d   :  { %v2501_v63 = vpop.eup %2500 }
 0xb2e   :  { %v2503_v31 = vpop.eup %2502  ;;  %v1294_v22 = vmul.f32 %v2501_v63, %v1277_v40  ;;  %vm1299_vm12 = vweird.f32 %v2501_v63 }
 0xb2f   :  { %v1359_v18 = vadd.f32 1.0, %v2503_v31  ;;  %vm1300_vm14 = vmor %vm1298_vm13, %vm1299_vm12 }
 0xb30   :  { %v1295_v47 = vsub.f32 1.0, %v1294_v22 }
 0xb31   :  { %2504 = vrcp.f32 %v1359_v18  ;;  %v1386_v11 = vand.u32 2147483648, %v1359_v18  ;;  %vm1380_vm2 = vweird.f32 %v1359_v18  ;;  %v1384_v55 = vand.u32 2147483647, %v1359_v18 }
 0xb32   :  { %v1296_v15 = vmul.f32 %v2501_v63, %v1295_v47 }
 0xb33   :  { %v1387_v53 = vor.u32 1.1754944e-38, %v1386_v11  ;;  %vm1385_vm4 = vcmp.eq.f32.partialorder %v1384_v55, 8.507059e+37 }
 0xb34   :  { %v1297_v46 = vadd.f32 %v2501_v63, %v1296_v15 }
 0xb36   :  { %v1301_v37 = vsel %vm1300_vm14, %v2501_v63, %v1297_v46 }
 0xb37   :  { %v2505_v48 = vpop.eup %2504  ;;  %v1306_v59 = vsel %vm1303_vm15, %v1305_v41, %v1301_v37 }
 0xb38   :  { %v1376_v54 = vmul.f32 %v2505_v48, %v1359_v18  ;;  %vm1381_vm1 = vweird.f32 %v2505_v48 }
 0xb39   :  { %vm1382_vm3 = vmor %vm1380_vm2, %vm1381_vm1 }
 0xb3a   :  { %v1377_v17 = vsub.f32 1.0, %v1376_v54 }
 0xb3c   :  { %v1378_v1 = vmul.f32 %v2505_v48, %v1377_v17 }
 0xb3e   :  { %v1379_v24 = vadd.f32 %v2505_v48, %v1378_v1 }
 0xb40   :  { %v1383_v61 = vsel %vm1382_vm3, %v2505_v48, %v1379_v24 }
 0xb41   :  { %v1388_v10 = vsel %vm1385_vm4, %v1387_v53, %v1383_v61 }
 0xb7e   :  { %v1323_v2 = vpop.permute.xlu2 %1322 }
 0xb7f   :  { %v1325_v4 = vmul.f32 %v1323_v2, %v1306_v59 }
 0xb81   :  { %v1409_v50 = vpack.c.bf16 %v1325_v4, %v1325_v4 }
 0xb83   :  { %2262 = vmatmul.msk.bf16.vlgmr.msrb.gmra.mxu0 %vm246_vm9, %v1409_v50  ;;  %2263 = vmatmul.msk.bf16.vlgmr.msrb.gmra.mxu1 %vm246_vm9, %v1409_v50 }
 0xb84   :  { %1646 = vmatpush.bf16.msrb.mxu0 %v2712_v36  ;;  %1659 = vmatpush.bf16.msrb.mxu1 %v2709_v35 }
 0xb88   :  { %1647 = vmatpush.bf16.msrb.mxu0 %v2721_v44  ;;  %1660 = vmatpush.bf16.msrb.mxu1 %v2718_v43 }
 0xb8c   :  { %v1405_v52 = vpop.permute.xlu1 %1404  ;;  %1648 = vmatpush.bf16.msrb.mxu0 %v2733_v51  ;;  %1661 = vmatpush.bf16.msrb.mxu1 %v2729_v49 }
 0xb8d   :  { %v1407_v6 = vmul.f32 %v1405_v52, %v1388_v10 }
 0xb8f   :  { %v1408_v13 = vpack.c.bf16 %v1407_v6, %v1407_v6 }
 0xb90   :  { %1649 = vmatpush.bf16.msrb.mxu0 %v2750_v62  ;;  %1662 = vmatpush.bf16.msrb.mxu1 %v2748_v60 }
 0xb91   :  { %2264 = vmatmul.msk.bf16.vlgmr.msra.gmra.mxu2 %vm246_vm9, %v1408_v13  ;;  %2265 = vmatmul.msk.bf16.vlgmr.msra.gmra.mxu3 %vm246_vm9, %v1408_v13 }
 0xb92   :  { %1743 = vmatpush.bf16.msra.mxu3 %v2634_v3  ;;  %1730 = vmatpush.bf16.msra.mxu2 %v2642_v14 }
 0xb93   :  { %2268 = vmatmul.msk.bf16.vlgmr.msra.gmra.mxu0 %vm246_vm9, %v1408_v13  ;;  %2269 = vmatmul.msk.bf16.vlgmr.msra.gmra.mxu1 %vm246_vm9, %v1408_v13 }
 0xb94   :  { %1817 = vmatpush.bf16.msra.mxu0 %v2684_v5  ;;  %1830 = vmatpush.bf16.msra.mxu1 %v2682_v0 }
 0xb96   :  { %1744 = vmatpush.bf16.msra.mxu3 %v2637_v8  ;;  %1731 = vmatpush.bf16.msra.mxu2 %v2649_v23 }
 0xb98   :  { %1818 = vmatpush.bf16.msra.mxu0 %v2691_v12  ;;  %1831 = vmatpush.bf16.msra.mxu1 %v2687_v7 }
 0xb9a   :  { %1745 = vmatpush.bf16.msra.mxu3 %v2645_v19  ;;  %1732 = vmatpush.bf16.msra.mxu2 %v2655_v27  ;;  %v173_v19 = vadd.f32 %v2871_v25, %v2675_v42  ;;  %v202_v27 = vadd.f32 %v2873_v28, %v2668_v33 }
 0xb9c   :  { %1819 = vmatpush.bf16.msra.mxu0 %v2699_v20  ;;  %1832 = vmatpush.bf16.msra.mxu1 %v2695_v16 }
 0xb9e   :  { %1746 = vmatpush.bf16.msra.mxu3 %v2652_v26  ;;  %1733 = vmatpush.bf16.msra.mxu2 %v2660_v30 }
 0xba0   :  { %1820 = vmatpush.bf16.msra.mxu0 %v2707_v34  ;;  %1833 = vmatpush.bf16.msra.mxu1 %v2703_v32 }
 0xc00   :  { %v1422_v3 = vpop.f32.mrf.mxu0  ;;  %v1435_v8 = vpop.f32.mrf.mxu1 }
 0xc08   :  { %v1424_v14 = vpop.f32.mrf.mxu0  ;;  %v1437_v23 = vpop.f32.mrf.mxu1 }
 0xc10   :  { %v1535_v0 = vpop.f32.mrf.mxu0  ;;  %v1548_v5 = vpop.f32.mrf.mxu1 }
 0xc11   :  { %v1536_v7 = vadd.f32 %v1535_v0, %v173_v19  ;;  %v3113_v26 = vadd.f32 %v1548_v5, %v202_v27 }
 0xc13   :  { %2506 = vtanh.f32 %v3113_v26  ;;  %v2270_v31 = vmul.f32 -1.442695, %v1536_v7 }
 0xc14   :  { %v1451_v30 = vpop.f32.mrf.mxu2  ;;  %v1464_v12 = vpop.f32.mrf.mxu3 }
 0xc15   :  { %v1452_v16 = vadd.f32 %v1451_v30, %v1422_v3  ;;  %v1465_v20 = vadd.f32 %v1464_v12, %v1435_v8 }
 0xc17   :  { %v3117_v32 = vadd.f32 %v1465_v20, %v2785_v29  ;;  %v1468_v22 = vadd.f32 %v1452_v16, %v2797_v58 }
 0xc18   :  { %v1537_v34 = vpop.f32.mrf.mxu0  ;;  %v1550_v40 = vpop.f32.mrf.mxu1 }
 0xc19   :  { %v2507_v25 = vpop.eup %2506  ;;  %2508 = vtanh.f32 %v3117_v32  ;;  %v2266_v18 = vmul.f32 -1.442695, %v1468_v22  ;;  %v2267_v20 = vmul.f32 -1.442695, %v3117_v32 }
 0xc1a   :  { %1593 = vrot.lane.b32.xlu1 %v2507_v25, %s2600_s28  ;;  %2510 = vpow2.f32 %v2270_v31 }
 0xc1b   :  { %2512 = vpow2.f32 %v2266_v18 }
 0xc1c   :  { %v1453_v28 = vpop.f32.mrf.mxu2  ;;  %v1466_v45 = vpop.f32.mrf.mxu3 }
 0xc1f   :  { %v2509_v63 = vpop.eup %2508 }
 0xc20   :  { %1511 = vrot.lane.b32.xlu0 %v2509_v63, %s2600_s28  ;;  %v2511_v47 = vpop.eup %2510 }
 0xc21   :  { %v1558_v15 = vadd.f32 1.0, %v2511_v47  ;;  %v2513_v48 = vpop.eup %2512 }
 0xc22   :  { %v1476_v46 = vadd.f32 1.0, %v2513_v48 }
 0xc23   :  { %2514 = vrcp.f32 %v1558_v15  ;;  %v1571_v4 = vand.u32 2147483648, %v1558_v15  ;;  %vm1565_vm6 = vweird.f32 %v1558_v15  ;;  %v1569_v50 = vand.u32 2147483647, %v1558_v15 }
 0xc24   :  { %2516 = vrcp.f32 %v1476_v46  ;;  %v1489_v10 = vand.u32 2147483648, %v1476_v46  ;;  %vm1483_vm11 = vweird.f32 %v1476_v46  ;;  %v1487_v6 = vand.u32 2147483647, %v1476_v46 }
 0xc25   :  { %v1572_v11 = vor.u32 1.1754944e-38, %v1571_v4  ;;  %vm1570_vm8 = vcmp.eq.f32.partialorder %v1569_v50, 8.507059e+37 }
 0xc26   :  { %v1490_v3 = vor.u32 1.1754944e-38, %v1489_v10  ;;  %vm1488_vm13 = vcmp.eq.f32.partialorder %v1487_v6, 8.507059e+37  ;;  %v204_v6 = vadd.f32 %v2877_v39, %v2668_v33 }
 0xc29   :  { %v2515_v56 = vpop.eup %2514 }
 0xc2a   :  { %v1561_v21 = vmul.f32 %v2515_v56, %v1558_v15  ;;  %v2517_v54 = vpop.eup %2516  ;;  %vm1566_vm5 = vweird.f32 %v2515_v56 }
 0xc2b   :  { %v1479_v41 = vmul.f32 %v2517_v54, %v1476_v46  ;;  %vm1567_vm7 = vmor %vm1565_vm6, %vm1566_vm5  ;;  %vm1484_vm10 = vweird.f32 %v2517_v54 }
 0xc2c   :  { %v1562_v37 = vsub.f32 1.0, %v1561_v21  ;;  %vm1485_vm12 = vmor %vm1483_vm11, %vm1484_vm10 }
 0xc2d   :  { %v1480_v59 = vsub.f32 1.0, %v1479_v41 }
 0xc2e   :  { %v1563_v17 = vmul.f32 %v2515_v56, %v1562_v37 }
 0xc2f   :  { %v1481_v1 = vmul.f32 %v2517_v54, %v1480_v59 }
 0xc30   :  { %v1564_v2 = vadd.f32 %v2515_v56, %v1563_v17 }
 0xc31   :  { %v1482_v55 = vadd.f32 %v2517_v54, %v1481_v1 }
 0xc32   :  { %v1568_v24 = vsel %vm1567_vm7, %v2515_v56, %v1564_v2 }
 0xc33   :  { %v1573_v53 = vsel %vm1570_vm8, %v1572_v11, %v1568_v24  ;;  %v1486_v13 = vsel %vm1485_vm12, %v2517_v54, %v1482_v55 }
 0xc34   :  { %v1491_v14 = vsel %vm1488_vm13, %v1490_v3, %v1486_v13  ;;  %v1591_v7 = vmul.f32 %v1573_v53, %v3068_v9 }
 0xc35   :  { %v1509_v19 = vmul.f32 %v1491_v14, %v3073_v57  ;;  %v2271_v57 = vmul.f32 -1.442695, %v3113_v26 }
 0xc8c   :  { %v1594_v61 = vpop.permute.xlu1 %1593 }
 0xc8d   :  { %v1596_v52 = vmul.f32 %v1594_v61, %v1573_v53 }
 0xc8f   :  { %1598 = vrot.lane.b32.xlu0 %v1596_v52, %s2600_s28 }
 0xc92   :  { %v1512_v8 = vpop.permute.xlu0 %1511 }
 0xc93   :  { %v1514_v23 = vmul.f32 %v1512_v8, %v1491_v14 }
 0xc95   :  { %1516 = vrot.lane.b32.xlu2 %v1514_v23, %s2600_s28 }
 0xcef   :  { %v1517_v27 = vpop.permute.xlu2 %1516 }
 0xcf0   :  { %v3126_v0 = vadd.f32 %v1517_v27, %v1509_v19 }
 0xcf2   :  { %2518 = vtanh.f32 %v3126_v0 }
 0xcf8   :  { %v2519_v5 = vpop.eup %2518 }
 0xcf9   :  { %1522 = vrot.lane.b32.xlu1 %v2519_v5, %s2600_s28 }
 0xd01   :  { %v1599_v30 = vpop.permute.xlu0 %1598 }
 0xd02   :  { %v3131_v12 = vadd.f32 %v1599_v30, %v1591_v7  ;;  %v175_v7 = vadd.f32 %v2875_v38, %v2675_v42 }
 0xd04   :  { %2520 = vtanh.f32 %v3131_v12 }
 0xd05   :  { %2522 = vpow2.f32 %v2271_v57 }
 0xd06   :  { %2524 = vpow2.f32 %v2267_v20 }
 0xd0a   :  { %v2521_v16 = vpop.eup %2520 }
 0xd0b   :  { %1604 = vrot.lane.b32.xlu2 %v2521_v16, %s2600_s28  ;;  %v2523_v34 = vpop.eup %2522 }
 0xd0c   :  { %v1559_v40 = vadd.f32 1.0, %v2523_v34  ;;  %v2525_v25 = vpop.eup %2524 }
 0xd0d   :  { %v1477_v28 = vadd.f32 1.0, %v2525_v25 }
 0xd0e   :  { %2526 = vrcp.f32 %v1559_v40  ;;  %v1586_v26 = vand.u32 2147483648, %v1559_v40  ;;  %vm1580_vm15 = vweird.f32 %v1559_v40  ;;  %v1584_v48 = vand.u32 2147483647, %v1559_v40 }
 0xd0f   :  { %2528 = vrcp.f32 %v1477_v28  ;;  %v1504_v41 = vand.u32 2147483648, %v1477_v28  ;;  %vm1498_vm4 = vweird.f32 %v1477_v28  ;;  %v1502_v59 = vand.u32 2147483647, %v1477_v28 }
 0xd10   :  { %v1587_v56 = vor.u32 1.1754944e-38, %v1586_v26  ;;  %vm1585_vm2 = vcmp.eq.f32.partialorder %v1584_v48, 8.507059e+37 }
 0xd11   :  { %v1505_v50 = vor.u32 1.1754944e-38, %v1504_v41  ;;  %vm1503_vm6 = vcmp.eq.f32.partialorder %v1502_v59, 8.507059e+37 }
 0xd14   :  { %v2527_v9 = vpop.eup %2526 }
 0xd15   :  { %v1576_v45 = vmul.f32 %v2527_v9, %v1559_v40  ;;  %v2529_v63 = vpop.eup %2528  ;;  %vm1581_vm14 = vweird.f32 %v2527_v9 }
 0xd16   :  { %v1494_v22 = vmul.f32 %v2529_v63, %v1477_v28  ;;  %vm1582_vm1 = vmor %vm1580_vm15, %vm1581_vm14  ;;  %vm1499_vm3 = vweird.f32 %v2529_v63 }
 0xd17   :  { %v1577_v31 = vsub.f32 1.0, %v1576_v45  ;;  %vm1500_vm5 = vmor %vm1498_vm4, %vm1499_vm3 }
 0xd18   :  { %v1495_v47 = vsub.f32 1.0, %v1494_v22 }
 0xd19   :  { %v1578_v18 = vmul.f32 %v2527_v9, %v1577_v31 }
 0xd1a   :  { %v1496_v32 = vmul.f32 %v2529_v63, %v1495_v47 }
 0xd1b   :  { %v1579_v15 = vadd.f32 %v2527_v9, %v1578_v18 }
 0xd1c   :  { %v1497_v21 = vadd.f32 %v2529_v63, %v1496_v32 }
 0xd1d   :  { %v1583_v46 = vsel %vm1582_vm1, %v2527_v9, %v1579_v15 }
 0xd1e   :  { %v1588_v54 = vsel %vm1585_vm2, %v1587_v56, %v1583_v46  ;;  %v1501_v4 = vsel %vm1500_vm5, %v2529_v63, %v1497_v21 }
 0xd1f   :  { %v1506_v1 = vsel %vm1503_vm6, %v1505_v50, %v1501_v4 }
 0xd65   :  { %v1605_v37 = vpop.permute.xlu2 %1604 }
 0xd66   :  { %v1607_v17 = vmul.f32 %v1605_v37, %v1588_v54 }
 0xd68   :  { %v1608_v2 = vpack.c.bf16 %v1607_v17, %v1607_v17 }
 0xd6a   :  { %2274 = vmatmul.msk.bf16.vlgmr.msrb.gmra.mxu0 %vm246_vm9, %v1608_v2  ;;  %2275 = vmatmul.msk.bf16.vlgmr.msrb.gmra.mxu1 %vm246_vm9, %v1608_v2 }
 0xd6b   :  { %v1523_v24 = vpop.permute.xlu1 %1522 }
 0xd6c   :  { %v1525_v11 = vmul.f32 %v1523_v24, %v1506_v1 }
 0xd6e   :  { %v1609_v55 = vpack.c.bf16 %v1525_v11, %v1525_v11 }
 0xd70   :  { %2272 = vmatmul.msk.bf16.vlgmr.msrb.gmra.mxu2 %vm246_vm9, %v1609_v55  ;;  %2273 = vmatmul.msk.bf16.vlgmr.msrb.gmra.mxu3 %vm246_vm9, %v1609_v55 }
 0xd71   :  { %1859 = vmatpush.bf16.msrb.mxu3 %v2709_v35  ;;  %1846 = vmatpush.bf16.msrb.mxu2 %v2712_v36 }
 0xd75   :  { %1860 = vmatpush.bf16.msrb.mxu3 %v2718_v43  ;;  %1847 = vmatpush.bf16.msrb.mxu2 %v2721_v44 }
 0xd79   :  { %1861 = vmatpush.bf16.msrb.mxu3 %v2729_v49  ;;  %1848 = vmatpush.bf16.msrb.mxu2 %v2733_v51 }
 0xd7d   :  { %1862 = vmatpush.bf16.msrb.mxu3 %v2748_v60  ;;  %1849 = vmatpush.bf16.msrb.mxu2 %v2750_v62 }
 0xd80   :  { %2278 = vmatmul.msk.bf16.vlgmr.msra.gmra.mxu2 %vm246_vm9, %v1608_v2  ;;  %2279 = vmatmul.msk.bf16.vlgmr.msra.gmra.mxu3 %vm246_vm9, %v1608_v2 }
 0xde7   :  { %v1651_v61 = vpop.f32.mrf.mxu0  ;;  %v1664_v35 = vpop.f32.mrf.mxu1 }
 0xdef   :  { %v1653_v53 = vpop.f32.mrf.mxu0  ;;  %v1666_v36 = vpop.f32.mrf.mxu1 }
 0xdf3   :  { %v1622_v10 = vpop.f32.mrf.mxu2  ;;  %v1635_v43 = vpop.f32.mrf.mxu3 }
 0xdf4   :  { %v1652_v52 = vadd.f32 %v1651_v61, %v1622_v10  ;;  %v1665_v44 = vadd.f32 %v1664_v35, %v1635_v43 }
 0xdf6   :  { %v3152_v49 = vadd.f32 %v1665_v44, %v2785_v29  ;;  %v1668_v27 = vadd.f32 %v1652_v52, %v2797_v58 }
 0xdf8   :  { %2530 = vtanh.f32 %v3152_v49  ;;  %v2276_v5 = vmul.f32 -1.442695, %v1668_v27  ;;  %v2277_v61 = vmul.f32 -1.442695, %v3152_v49 }
 0xdfb   :  { %v1624_v51 = vpop.f32.mrf.mxu2  ;;  %v1637_v60 = vpop.f32.mrf.mxu3 }
 0xdfe   :  { %v2531_v62 = vpop.eup %2530 }
 0xdff   :  { %1711 = vrot.lane.b32.xlu0 %v2531_v62, %s2600_s28 }
 0xe03   :  { %v1735_v13 = vpop.f32.mrf.mxu2  ;;  %v1748_v3 = vpop.f32.mrf.mxu3 }
 0xe04   :  { %v3158_v8 = vadd.f32 %v1748_v3, %v204_v6  ;;  %v1736_v33 = vadd.f32 %v1735_v13, %v175_v7 }
 0xe06   :  { %2532 = vtanh.f32 %v3158_v8  ;;  %v2280_v16 = vmul.f32 -1.442695, %v1736_v33  ;;  %v2281_v53 = vmul.f32 -1.442695, %v3158_v8 }
 0xe07   :  { %2534 = vpow2.f32 %v2276_v5 }
 0xe0b   :  { %v1737_v14 = vpop.f32.mrf.mxu2  ;;  %v1750_v23 = vpop.f32.mrf.mxu3 }
 0xe0c   :  { %v2533_v19 = vpop.eup %2532 }
 0xe0d   :  { %1793 = vrot.lane.b32.xlu1 %v2533_v19, %s2600_s28  ;;  %v2535_v30 = vpop.eup %2534 }
 0xe0e   :  { %v1676_v39 = vadd.f32 1.0, %v2535_v30 }
 0xe10   :  { %2536 = vrcp.f32 %v1676_v39  ;;  %v1689_v63 = vand.u32 2147483648, %v1676_v39  ;;  %vm1683_vm8 = vweird.f32 %v1676_v39  ;;  %v1687_v31 = vand.u32 2147483647, %v1676_v39 }
 0xe11   :  { %2538 = vpow2.f32 %v2280_v16 }
 0xe12   :  { %v1690_v22 = vor.u32 1.1754944e-38, %v1689_v63  ;;  %vm1688_vm11 = vcmp.eq.f32.partialorder %v1687_v31, 8.507059e+37 }
 0xe16   :  { %v2537_v57 = vpop.eup %2536 }
 0xe17   :  { %v2539_v20 = vpop.eup %2538  ;;  %v1679_v34 = vmul.f32 %v2537_v57, %v1676_v39  ;;  %vm1684_vm7 = vweird.f32 %v2537_v57 }
 0xe18   :  { %v1758_v40 = vadd.f32 1.0, %v2539_v20  ;;  %vm1685_vm10 = vmor %vm1683_vm8, %vm1684_vm7 }
 0xe19   :  { %v1680_v25 = vsub.f32 1.0, %v1679_v34 }
 0xe1a   :  { %2540 = vrcp.f32 %v1758_v40  ;;  %v1771_v46 = vand.u32 2147483648, %v1758_v40  ;;  %vm1765_vm13 = vweird.f32 %v1758_v40  ;;  %v1769_v56 = vand.u32 2147483647, %v1758_v40 }
 0xe1b   :  { %v1681_v28 = vmul.f32 %v2537_v57, %v1680_v25 }
 0xe1c   :  { %v1772_v54 = vor.u32 1.1754944e-38, %v1771_v46  ;;  %vm1770_vm15 = vcmp.eq.f32.partialorder %v1769_v56, 8.507059e+37 }
 0xe1d   :  { %v1682_v45 = vadd.f32 %v2537_v57, %v1681_v28 }
 0xe1f   :  { %v1686_v38 = vsel %vm1685_vm10, %v2537_v57, %v1682_v45  ;;  %v2288_v45 = vld [vmem:[%s3236_s0 + $0x1c] sm:$0xf]  ;;  %vm1964_vm10 = vcmask 261120  }
 0xe20   :  { %v2541_v9 = vpop.eup %2540  ;;  %v1691_v15 = vsel %vm1688_vm11, %v1690_v22, %v1686_v38 }
 0xe21   :  { %v1761_v42 = vmul.f32 %v2541_v9, %v1758_v40  ;;  %vm1766_vm12 = vweird.f32 %v2541_v9  ;;  %v1709_v59 = vmul.f32 %v1691_v15, %v3126_v0 }
 0xe22   :  { %vm1767_vm14 = vmor %vm1765_vm13, %vm1766_vm12 }
 0xe23   :  { %v1762_v18 = vsub.f32 1.0, %v1761_v42 }
 0xe25   :  { %v1763_v48 = vmul.f32 %v2541_v9, %v1762_v18 }
 0xe27   :  { %v1764_v32 = vadd.f32 %v2541_v9, %v1763_v48 }
 0xe29   :  { %v1768_v21 = vsel %vm1767_vm14, %v2541_v9, %v1764_v32  ;;  %v2356_v9 = vld [vmem:[%s3238_s2] sm:$0xff] }
 0xe2a   :  { %v1773_v41 = vsel %vm1770_vm15, %v1772_v54, %v1768_v21  ;;  %1944 = vmatpush.bf16.msrb.mxu0 %v2356_v9  ;;  %v2358_v54 = vld [vmem:[%s3238_s2 + $0x10] sm:$0xff] }
 0xe2b   :  { %v1791_v1 = vmul.f32 %v1773_v41, %v3131_v12  ;;  %1974 = vmatpush.bf16.msrb.mxu1 %v2358_v54 }
 0xe71   :  { %v1712_v47 = vpop.permute.xlu0 %1711 }
 0xe72   :  { %v1714_v26 = vmul.f32 %v1712_v47, %v1691_v15 }
 0xe74   :  { %1716 = vrot.lane.b32.xlu2 %v1714_v26, %s2600_s28 }
 0xe7f   :  { %v1794_v37 = vpop.permute.xlu1 %1793 }
 0xe80   :  { %v1796_v17 = vmul.f32 %v1794_v37, %v1773_v41 }
 0xe82   :  { %1798 = vrot.lane.b32.xlu0 %v1796_v17, %s2600_s28 }
 0xece   :  { %v1717_v2 = vpop.permute.xlu2 %1716 }
 0xecf   :  { %v3168_v4 = vadd.f32 %v1717_v2, %v1709_v59 }
 0xed1   :  { %2542 = vtanh.f32 %v3168_v4 }
 0xed7   :  { %v2543_v50 = vpop.eup %2542 }
 0xed8   :  { %1722 = vrot.lane.b32.xlu1 %v2543_v50, %s2600_s28 }
 0xef4   :  { %v1799_v24 = vpop.permute.xlu0 %1798 }
 0xef5   :  { %v1801_v11 = vadd.f32 %v1799_v24, %v1791_v1 }
 0xef7   :  { %2544 = vtanh.f32 %v1801_v11 }
 0xef8   :  { %2546 = vpow2.f32 %v2277_v61 }
 0xefd   :  { %v2545_v55 = vpop.eup %2544 }
 0xefe   :  { %1804 = vrot.lane.b32.xlu2 %v2545_v55, %s2600_s28  ;;  %v2547_v0 = vpop.eup %2546 }
 0xeff   :  { %v1677_v35 = vadd.f32 1.0, %v2547_v0 }
 0xf01   :  { %2548 = vrcp.f32 %v1677_v35  ;;  %v1704_v62 = vand.u32 2147483648, %v1677_v35  ;;  %vm1698_vm2 = vweird.f32 %v1677_v35  ;;  %v1702_v49 = vand.u32 2147483647, %v1677_v35 }
 0xf02   :  { %2550 = vpow2.f32 %v2281_v53 }
 0xf03   :  { %v1705_v3 = vor.u32 1.1754944e-38, %v1704_v62  ;;  %vm1703_vm4 = vcmp.eq.f32.partialorder %v1702_v49, 8.507059e+37 }
 0xf07   :  { %v2549_v36 = vpop.eup %2548 }
 0xf08   :  { %v2551_v10 = vpop.eup %2550  ;;  %v1694_v43 = vmul.f32 %v2549_v36, %v1677_v35  ;;  %vm1699_vm1 = vweird.f32 %v2549_v36 }
 0xf09   :  { %v1759_v52 = vadd.f32 1.0, %v2551_v10  ;;  %vm1700_vm3 = vmor %vm1698_vm2, %vm1699_vm1 }
 0xf0a   :  { %v1695_v12 = vsub.f32 1.0, %v1694_v43 }
 0xf0b   :  { %2552 = vrcp.f32 %v1759_v52  ;;  %v1786_v30 = vand.u32 2147483648, %v1759_v52  ;;  %vm1780_vm6 = vweird.f32 %v1759_v52  ;;  %v1784_v33 = vand.u32 2147483647, %v1759_v52 }
 0xf0c   :  { %v1696_v44 = vmul.f32 %v2549_v36, %v1695_v12  ;;  %v2362_v12 = vld [vmem:[%s3239_s3 + $0x18] sm:$0xff] }
 0xf0d   :  { %v1787_v16 = vor.u32 1.1754944e-38, %v1786_v30  ;;  %vm1785_vm8 = vcmp.eq.f32.partialorder %v1784_v33, 8.507059e+37  ;;  %2043 = vmatpush.bf16.msra.mxu3 %v2362_v12  ;;  %v2359_v30 = vld [vmem:[%s3239_s3] sm:$0xff] }
 0xf0e   :  { %v1697_v60 = vadd.f32 %v2549_v36, %v1696_v44  ;;  %v2361_v44 = vld [vmem:[%s3239_s3 + $0x10] sm:$0xff] }
 0xf10   :  { %v1701_v13 = vsel %vm1700_vm3, %v2549_v36, %v1697_v60  ;;  %v2360_v60 = vld [vmem:[%s3239_s3 + $0x8] sm:$0xff] }
 0xf11   :  { %v2553_v51 = vpop.eup %2552  ;;  %v1706_v14 = vsel %vm1703_vm4, %v1705_v3, %v1701_v13  ;;  %2044 = vmatpush.bf16.msra.mxu3 %v2361_v44  ;;  %v90_v13 = vld [vmem:[%s3240_s4 + $0x3] ss:$0 sm:$0xff] }
 0xf12   :  { %v1776_v6 = vmul.f32 %v2553_v51, %v1759_v52  ;;  %vm1781_vm5 = vweird.f32 %v2553_v51  ;;  %v2364_v52 = vld [vmem:[%s3239_s3 + $0x28] sm:$0xff] }
 0xf13   :  { %vm1782_vm7 = vmor %vm1780_vm6, %vm1781_vm5  ;;  %2005 = vmatpush.bf16.msra.mxu2 %v2364_v52 }
 0xf14   :  { %v1777_v8 = vsub.f32 1.0, %v1776_v6 }
 0xf15   :  { %2045 = vmatpush.bf16.msra.mxu3 %v2360_v60 }
 0xf16   :  { %v1778_v5 = vmul.f32 %v2553_v51, %v1777_v8 }
 0xf18   :  { %v1779_v7 = vadd.f32 %v2553_v51, %v1778_v5 }
 0xf19   :  { %2046 = vmatpush.bf16.msra.mxu3 %v2359_v30 }
 0xf1a   :  { %v1783_v39 = vsel %vm1782_vm7, %v2553_v51, %v1779_v7  ;;  %v2363_v51 = vld [vmem:[%s3239_s3 + $0x20] sm:$0xff]  ;;  %vm2076_vm7 = vcmask 15360  }
 0xf1b   :  { %v1788_v57 = vsel %vm1785_vm8, %v1787_v16, %v1783_v39  ;;  %2006 = vmatpush.bf16.msra.mxu2 %v2363_v51 }
 0xf4a   :  { %v1723_v23 = vpop.permute.xlu1 %1722 }
 0xf4b   :  { %v1725_v19 = vmul.f32 %v1723_v23, %v1706_v14 }
 0xf4d   :  { %v1809_v27 = vpack.c.bf16 %v1725_v19, %v1725_v19 }
 0xf4f   :  { %2282 = vmatmul.msk.bf16.vlgmr.msra.gmra.mxu0 %vm246_vm9, %v1809_v27  ;;  %2283 = vmatmul.msk.bf16.vlgmr.msra.gmra.mxu1 %vm246_vm9, %v1809_v27 }
 0xf58   :  { %v1805_v20 = vpop.permute.xlu2 %1804 }
 0xf59   :  { %v1807_v34 = vmul.f32 %v1805_v20, %v1788_v57 }
 0xf5b   :  { %v1808_v40 = vpack.c.bf16 %v1807_v34, %v1807_v34 }
 0xf5d   :  { %2284 = vmatmul.msk.bf16.vlgmr.msrb.gmra.mxu2 %vm246_vm9, %v1808_v40  ;;  %2285 = vmatmul.msk.bf16.vlgmr.msrb.gmra.mxu3 %vm246_vm9, %v1808_v40 }
 0xf5f   :  { %2293 = vmatmul.msk.bf16.vlgmr.msrb.gmra.mxu0 %vm135_vm0, %v2288_v45 }
 0xfcc   :  { %v1822_v25 = vpop.f32.mrf.mxu0  ;;  %v1835_v28 = vpop.f32.mrf.mxu1 }
 0xfd4   :  { %v1824_v63 = vpop.f32.mrf.mxu0  ;;  %v1837_v31 = vpop.f32.mrf.mxu1 }
 0xfdc   :  { %v1946_v2 = vpop.f32.mrf.mxu0 }
 0xfe0   :  { %v1851_v42 = vpop.f32.mrf.mxu2  ;;  %v1864_v38 = vpop.f32.mrf.mxu3 }
 0xfe1   :  { %v1852_v22 = vadd.f32 %v1851_v42, %v1822_v25  ;;  %v1865_v18 = vadd.f32 %v1864_v38, %v1835_v28 }
 0xfe3   :  { %v3188_v47 = vadd.f32 %v1865_v18, %v2785_v29  ;;  %v1868_v32 = vadd.f32 %v1852_v22, %v2797_v58  ;;  %v2357_v29 = vld [vmem:[%s3238_s2 + $0x8] sm:$0xff]  ;;  %v89_v58 = vld [vmem:[%s3240_s4 + $0x2] ss:$0 sm:$0xff]  ;;  %v91_v22 = vld [vmem:[%s3240_s4 + $0x4] ss:$0 sm:$0xff] }
 0xfe4   :  { %1975 = vmatpush.bf16.msrb.mxu1 %v2357_v29  ;;  %v1947_v50 = vadd.f32 %v1946_v2, %v89_v58  ;;  %v1948_v35 = vpop.f32.mrf.mxu0 }
 0xfe5   :  { %2554 = vtanh.f32 %v3188_v47  ;;  %v2286_v46 = vmul.f32 -1.442695, %v1868_v32  ;;  %v2287_v5 = vmul.f32 -1.442695, %v3188_v47 }
 0xfe6   :  { %v1950_v1 = vmax.f32 %v1947_v50, 0.0 }
 0xfe7   :  { %2556 = vpow2.f32 %v2286_v46 }
 0xfe8   :  { %v1853_v15 = vpop.f32.mrf.mxu2  ;;  %v1866_v26 = vpop.f32.mrf.mxu3  ;;  %v1951_v55 = vpack.c.bf16 %v1950_v1, %v1950_v1 }
 0xfea   :  { %2302 = vmatmul.msk.bf16.vlgmr.msrb.gmra.mxu1 %vm1964_vm10, %v1951_v55 }
 0xfeb   :  { %v2555_v48 = vpop.eup %2554 }
 0xfec   :  { %1911 = vrot.lane.b32.xlu0 %v2555_v48, %s2600_s28 }
 0xfed   :  { %v2557_v56 = vpop.eup %2556 }
 0xfee   :  { %v1876_v21 = vadd.f32 1.0, %v2557_v56 }
 0xff0   :  { %2558 = vrcp.f32 %v1876_v21  ;;  %v1889_v11 = vand.u32 2147483648, %v1876_v21  ;;  %vm1883_vm11 = vweird.f32 %v1876_v21  ;;  %v1887_v61 = vand.u32 2147483647, %v1876_v21 }
 0xff2   :  { %v1890_v53 = vor.u32 1.1754944e-38, %v1889_v11  ;;  %vm1888_vm13 = vcmp.eq.f32.partialorder %v1887_v61, 8.507059e+37 }
 0xff6   :  { %v2559_v37 = vpop.eup %2558 }
 0xff7   :  { %v1879_v41 = vmul.f32 %v2559_v37, %v1876_v21  ;;  %vm1884_vm0 = vweird.f32 %v2559_v37  ;;  %v2053_v21 = vlaneseq }
 0xff8   :  { %vm1885_vm12 = vmor %vm1883_vm11, %vm1884_vm0 }
 0xff9   :  { %v1880_v17 = vsub.f32 1.0, %v1879_v41 }
 0xffb   :  { %v1881_v59 = vmul.f32 %v2559_v37, %v1880_v17 }
 0xffd   :  { %v1882_v24 = vadd.f32 %v2559_v37, %v1881_v59 }
 0xfff   :  { %v1886_v0 = vsel %vm1885_vm12, %v2559_v37, %v1882_v24  ;;  %v2054_v37 = vand.u32 127, %v2053_v21 }
0x1000   :  { %v1891_v10 = vsel %vm1888_vm13, %v1890_v53, %v1886_v0 }
0x1001   :  { %v1909_v62 = vmul.f32 %v1891_v10, %v3168_v4  ;;  %vm2055_vm4 = vcmp.eq.s32.totalorder %v2054_v37, 0 }
0x105e   :  { %v1912_v36 = vpop.permute.xlu0 %1911 }
0x105f   :  { %v1914_v43 = vmul.f32 %v1912_v36, %v1891_v10 }
0x1061   :  { %1916 = vrot.lane.b32.xlu1 %v1914_v43, %s2600_s28 }
0x1067   :  { %v1977_v3 = vpop.f32.mrf.mxu1 }
0x1068   :  { %v1978_v8 = vadd.f32 %v1977_v3, %v90_v13 }
0x106a   :  { %v1981_v14 = vmax.f32 %v1978_v8, 0.0 }
0x106c   :  { %v1983_v19 = vpack.c.bf16 %v1981_v14, %v1981_v14 }
0x106e   :  { %2311 = vmatmul.msk.bf16.vlgmr.msra.gmra.mxu2 %vm1964_vm10, %v1983_v19 }
0x106f   :  { %v1979_v27 = vpop.f32.mrf.mxu1 }
0x10d3   :  { %v1917_v49 = vpop.permute.xlu1 %1916 }
0x10d4   :  { %v1919_v6 = vadd.f32 %v1917_v49, %v1909_v62 }
0x10d6   :  { %2560 = vtanh.f32 %v1919_v6 }
0x10d7   :  { %2562 = vpow2.f32 %v2287_v5 }
0x10dc   :  { %v2561_v23 = vpop.eup %2560 }
0x10dd   :  { %1922 = vrot.lane.b32.xlu2 %v2561_v23, %s2600_s28  ;;  %v2563_v4 = vpop.eup %2562 }
0x10de   :  { %v1877_v7 = vadd.f32 1.0, %v2563_v4 }
0x10e0   :  { %2564 = vrcp.f32 %v1877_v7  ;;  %v1904_v34 = vand.u32 2147483648, %v1877_v7  ;;  %vm1898_vm15 = vweird.f32 %v1877_v7  ;;  %v1902_v40 = vand.u32 2147483647, %v1877_v7 }
0x10e2   :  { %v1905_v28 = vor.u32 1.1754944e-38, %v1904_v34  ;;  %vm1903_vm2 = vcmp.eq.f32.partialorder %v1902_v40, 8.507059e+37 }
0x10e6   :  { %v2565_v33 = vpop.eup %2564 }
0x10e7   :  { %v1894_v39 = vmul.f32 %v2565_v33, %v1877_v7  ;;  %vm1899_vm14 = vweird.f32 %v2565_v33 }
0x10e8   :  { %vm1900_vm1 = vmor %vm1898_vm15, %vm1899_vm14 }
0x10e9   :  { %v1895_v16 = vsub.f32 1.0, %v1894_v39 }
0x10eb   :  { %v1896_v57 = vmul.f32 %v2565_v33, %v1895_v16 }
0x10ed   :  { %v1897_v20 = vadd.f32 %v2565_v33, %v1896_v57 }
0x10ef   :  { %v1901_v25 = vsel %vm1900_vm1, %v2565_v33, %v1897_v20 }
0x10f0   :  { %v1906_v9 = vsel %vm1903_vm2, %v1905_v28, %v1901_v25 }
0x10f1   :  { %v2008_v42 = vpop.f32.mrf.mxu2 }
0x10f9   :  { %v2010_v38 = vpop.f32.mrf.mxu2 }
0x1137   :  { %v1923_v45 = vpop.permute.xlu2 %1922 }
0x1138   :  { %v1925_v63 = vmul.f32 %v1923_v45, %v1906_v9 }
0x113a   :  { %v1982_v31 = vpack.c.bf16 %v1925_v63, %v1925_v63 }
0x113c   :  { %2328 = vmatmul.msk.bf16.vlgmr.msra.gmra.mxu3 %vm246_vm9, %v1982_v31 }
0x11bf   :  { %v2048_v18 = vpop.f32.mrf.mxu3 }
0x11c0   :  { %v2049_v47 = vadd.f32 %v2048_v18, %v2008_v42 }
0x11c2   :  { %v2052_v15 = vadd.f32 %v2049_v47, %v91_v22 }
0x11c4   :  { %v2329_v26 = vmul.f32 -1.442695, %v2052_v15 }
0x11c6   :  { %2566 = vpow2.f32 %v2329_v26 }
0x11c7   :  { %v2050_v48 = vpop.f32.mrf.mxu3 }
0x11cc   :  { %v2567_v32 = vpop.eup %2566 }
0x11cd   :  { %v2059_v46 = vadd.f32 1.0, %v2567_v32 }
0x11cf   :  { %2568 = vrcp.f32 %v2059_v46  ;;  %v2071_v41 = vand.u32 2147483648, %v2059_v46  ;;  %v2069_v58 = vand.u32 2147483647, %v2059_v46  ;;  %vm2065_vm3 = vweird.f32 %v2059_v46 }
0x11d1   :  { %v2072_v2 = vor.u32 1.1754944e-38, %v2071_v41  ;;  %vm2070_vm6 = vcmp.eq.f32.partialorder %v2069_v58, 8.507059e+37 }
0x11d5   :  { %v2569_v56 = vpop.eup %2568 }
0x11d6   :  { %v2061_v54 = vmul.f32 %v2569_v56, %v2059_v46  ;;  %vm2066_vm9 = vweird.f32 %v2569_v56 }
0x11d7   :  { %vm2067_vm5 = vmor %vm2065_vm3, %vm2066_vm9 }
0x11d8   :  { %v2062_v29 = vsub.f32 1.0, %v2061_v54 }
0x11da   :  { %v2063_v17 = vmul.f32 %v2569_v56, %v2062_v29 }
0x11dc   :  { %v2064_v59 = vadd.f32 %v2569_v56, %v2063_v17 }
0x11de   :  { %v2068_v50 = vsel %vm2067_vm5, %v2569_v56, %v2064_v59 }
0x11df   :  { %v2073_v1 = vsel %vm2070_vm6, %v2072_v2, %v2068_v50 }
0x11e0   :  { %v2075_v24 = vsel %vm2055_vm4, %v2052_v15, %v2073_v1 }
0x11e1   :  { %2077 = vst.msk [vmem:[%s3241_s5] sm:$0xff] %vm2076_vm7, %v2075_v24 }
0x11e2   :  { %2082 = vsyncpa [#allocation3], 1 }

</bundles_post_ra>
